<compile_context>
chip_gen: v5e
topology: v5e:2x2
jax: 0.10.0
libtpu: 0.0.40
codegen_flags: <defaults>
</compile_context>

<pallas_src>
from collections import namedtuple

import jax
import jax.numpy as jnp
from jax.experimental import pallas as pl
from jax.experimental.pallas import tpu as pltpu

# ----------------------------- config (small, synthetic) ---------------------
B = 2          # batch
S = 8          # sequence length
H = 32         # hidden size
NH = 2         # attention heads
HD = H // NH   # head dim
FF = 64        # feed-forward dim
VOCAB = 128    # vocab size
NLABELS = 2    # MultiRC is binary classification
NLAYERS = 2    # encoder layers
BS = B * S     # flattened rows
LANE = 128     # lane width for packed/param/output slabs

WrappedBackboneOutput = namedtuple("WrappedBackboneOutput", ["logits", "pooler_output"])


# ----------------------------- in-kernel helpers ------------------------------
def _layernorm(x, g, b, eps=1e-12):
    # f32 statistics (keeps v5e-friendly f32 elementwise path).
    mu = jnp.mean(x, axis=-1, keepdims=True)
    var = jnp.mean((x - mu) ** 2, axis=-1, keepdims=True)
    return (x - mu) * jax.lax.rsqrt(var + eps) * g + b


def _wdot(x, w_bf16):
    # bf16 MXU operands, f32 accumulation; elementwise math stays f32.
    return jnp.dot(x.astype(jnp.bfloat16), w_bf16, preferred_element_type=jnp.float32)


# ----------------------------- single fused kernel ----------------------------
def fused_forward_kernel(x_ref, wqkv_ref, wo_ref, w1_ref, w2_ref,
                         small_ref, whead_ref, out_ref):
    x = x_ref[...]                           # [BS, H] f32 (batch flattened)
    small = small_ref[...]                   # [NLAYERS*8 + 8, 128] f32 packed params

    # Block-diagonal (per-sequence) attention bias, built once from iotas using
    # only compares/selects (no integer division on the VPU).
    row = jax.lax.broadcasted_iota(jnp.int32, (BS, BS), 0)
    col = jax.lax.broadcasted_iota(jnp.int32, (BS, BS), 1)
    same = None
    for b in range(B):
        blk = ((row >= b * S) & (row < (b + 1) * S)
               & (col >= b * S) & (col < (b + 1) * S))
        same = blk if same is None else (same | blk)
    attn_bias = jnp.where(same, jnp.float32(0.0), jnp.float32(-1e30))   # [BS, BS]

    for l in range(NLAYERS):                 # static unroll over layers
        r = l * 8
        bqkv = small[r + 0:r + 1, 0:3 * H]
        b1   = small[r + 1:r + 2, 0:FF]
        bo   = small[r + 2:r + 3, 0:H]
        ln1g = small[r + 3:r + 4, 0:H]
        ln1b = small[r + 4:r + 5, 0:H]
        b2   = small[r + 5:r + 6, 0:H]
        ln2g = small[r + 6:r + 7, 0:H]
        ln2b = small[r + 7:r + 8, 0:H]

        # Fused QKV projection for the whole flattened batch.
        # (1/sqrt(head_dim) already folded into the Q weight columns at init.)
        qkv = _wdot(x, wqkv_ref[l]) + bqkv                  # [BS, 3H] f32

        # Per-head attention batched over the full flattened batch with a
        # block-diagonal bias; head contexts stay in registers (no VMEM scratch).
        head_ctx = []
        for h in range(NH):
            c0 = h * HD
            qh = qkv[:, c0:c0 + HD]                          # [BS, HD]
            kh = qkv[:, H + c0:H + c0 + HD]                  # [BS, HD]
            vh = qkv[:, 2 * H + c0:2 * H + c0 + HD]          # [BS, HD]
            # NT contraction — no explicit transpose of kh.
            scores = jax.lax.dot_general(
                qh, kh, (((1,), (1,)), ((), ())),
                preferred_element_type=jnp.float32) + attn_bias      # [BS, BS]
            scores = scores - jnp.max(scores, axis=-1, keepdims=True)
            p = jnp.exp(scores)
            p = p * pl.reciprocal(jnp.sum(p, axis=-1, keepdims=True), approx=True)
            head_ctx.append(jnp.dot(p, vh, preferred_element_type=jnp.float32))
        ctx = jnp.concatenate(head_ctx, axis=-1)             # [BS, H] register value

        attn_out = _wdot(ctx, wo_ref[l]) + bo
        x1 = _layernorm(x + attn_out, ln1g, ln1b)

        hmid = _wdot(x1, w1_ref[l]) + b1
        hmid = jax.nn.gelu(hmid)             # TODO(synk): BERT uses exact erf GELU; tanh approx kept for safe Mosaic lowering
        ffn = _wdot(hmid, w2_ref[l]) + b2
        x = _layernorm(x1 + ffn, ln2g, ln2b)

    # ----- pooler + classifier on the CLS rows (position 0 of each sequence) -----
    cls = jnp.concatenate([x[b * S:b * S + 1, :] for b in range(B)], axis=0)  # [B, H]

    hr = NLAYERS * 8
    bp = small[hr:hr + 1, 0:H]                # [1, H]
    bc = small[hr:hr + 1, H:H + NLABELS]      # [1, NLABELS]
    whead = whead_ref[...]                    # [H, 128] bf16: wp | wc | pad
    wp = whead[:, 0:H]
    wc = whead[:, H:H + NLABELS]

    pooled = jnp.tanh(_wdot(cls, wp) + bp)
    logits = _wdot(pooled, wc) + bc           # [B, NLABELS]

    # Single lane-dense output slab: cls | logits | zero pad -> one unmasked store.
    out_ref[...] = jnp.concatenate(
        [cls, logits, jnp.zeros((B, LANE - H - NLABELS), jnp.float32)], axis=-1)


def _full_spec(a):
    nd = a.ndim
    return pl.BlockSpec(a.shape, lambda i, _nd=nd: (0,) * _nd)


def fused_forward(x_emb, p):
    inputs = [x_emb, p["wqkv"], p["wo"], p["w1"], p["w2"], p["small"], p["whead"]]
    out = pl.pallas_call(
        fused_forward_kernel,
        out_shape=jax.ShapeDtypeStruct((B, LANE), jnp.float32),
        grid=(1,),                             # single step: whole batch + all layers
        in_specs=[_full_spec(a) for a in inputs],
        out_specs=pl.BlockSpec((B, LANE), lambda i: (0, 0)),
        compiler_params=pltpu.CompilerParams(dimension_semantics=("arbitrary",)),
    )(*inputs)
    return out


# ----------------------------- full wrapped-backbone forward ------------------
@jax.jit
def wrapped_backbone_forward(token_ids, params):
    # Embedding lookup + position embedding (glue, plain JAX).
    x = params["tok_emb"][token_ids] + params["pos_emb"][None, :, :]   # [B, S, H]
    x = x.reshape(B * S, H).astype(jnp.float32)

    out = fused_forward(x, params)             # [B, 128] packed slab
    cls_hidden = out[:, :H]                    # == hidden_states[-1][:, 0]
    logits = out[:, H:H + NLABELS]

    # Matches WrappedBackboneModel: (logits, hidden_states[-1][:, 0])
    return WrappedBackboneOutput(logits=logits, pooler_output=cls_hidden)


# ----------------------------- deterministic parameter init -------------------
def init_params(key):
    n_draws = 2 + NLAYERS * 6 + 2
    ks = iter(jax.random.split(key, n_draws))
    nrm = lambda shape, scale=0.02: (scale * jax.random.normal(next(ks), shape)
                                     ).astype(jnp.float32)

    tok_emb = nrm((VOCAB, H))
    pos_emb = nrm((S, H))

    attn_scale = 1.0 / (HD ** 0.5)

    def pad_row(v):
        v = jnp.asarray(v, jnp.float32).reshape(-1)
        return jnp.pad(v, (0, LANE - v.shape[0]))

    wqkv, wo, w1, w2 = [], [], [], []
    small_rows = []
    for _ in range(NLAYERS):
        wq, wk, wv = nrm((H, H)), nrm((H, H)), nrm((H, H))
        # Fold 1/sqrt(head_dim) attention scale into Q columns (constant fold).
        wqkv.append(jnp.concatenate([wq * attn_scale, wk, wv], axis=1))   # [H, 3H]
        wo.append(nrm((H, H)))
        w1.append(nrm((H, FF)))
        w2.append(nrm((FF, H)))
        small_rows += [
            pad_row(jnp.zeros((3 * H,))),   # bqkv
            pad_row(jnp.zeros((FF,))),      # b1
            pad_row(jnp.zeros((H,))),       # bo
            pad_row(jnp.ones((H,))),        # ln1 gamma
            pad_row(jnp.zeros((H,))),       # ln1 beta
            pad_row(jnp.zeros((H,))),       # b2
            pad_row(jnp.ones((H,))),        # ln2 gamma
            pad_row(jnp.zeros((H,))),       # ln2 beta
        ]

    # Classifier-head biases in one extra row: bp in lanes [0:H], bc in [H:H+NLABELS].
    small_rows.append(pad_row(jnp.zeros((H + NLABELS,))))
    while len(small_rows) % 8 != 0:           # sublane-align the packed slab
        small_rows.append(jnp.zeros((LANE,), jnp.float32))
    small = jnp.stack(small_rows, axis=0)     # [NLAYERS*8 + 8, 128] f32

    wp = nrm((H, H))
    wc = nrm((H, NLABELS))
    whead = jnp.zeros((H, LANE), jnp.float32)
    whead = whead.at[:, 0:H].set(wp)
    whead = whead.at[:, H:H + NLABELS].set(wc)

    bf16 = jnp.bfloat16
    return {
        "tok_emb": tok_emb,
        "pos_emb": pos_emb,
        "wqkv": jnp.stack(wqkv).astype(bf16),   # [NLAYERS, H, 3H]
        "wo":   jnp.stack(wo).astype(bf16),     # [NLAYERS, H, H]
        "w1":   jnp.stack(w1).astype(bf16),     # [NLAYERS, H, FF]
        "w2":   jnp.stack(w2).astype(bf16),     # [NLAYERS, FF, H]
        "small": small,                          # [NLAYERS*8 + 8, 128] f32 packed biases/LN
        "whead": whead.astype(bf16),             # [H, 128] bf16: wp | wc | pad
    }


# ----------------------------- main -------------------------------------------
if __name__ == "__main__":
    key = jax.random.PRNGKey(0)
    k_data, k_params = jax.random.split(key)

    token_ids = jax.random.randint(k_data, (B, S), 0, VOCAB, dtype=jnp.int32)
    params = init_params(k_params)

    out = wrapped_backbone_forward(token_ids, params)
    jax.block_until_ready((out.logits, out.pooler_output))

    assert out.logits.shape == (B, NLABELS)
    assert out.pooler_output.shape == (B, H)
    print("KERNEL_OK")
</pallas_src>

<mosaic_0001>
module attributes {stable_mosaic.version = 11 : i64} {
  func.func @fused_forward_kernel(%arg0: i32, %arg1: memref<16x32xf32, #tpu.memory_space<vmem>>, %arg2: memref<2x32x96xbf16, #tpu.memory_space<vmem>>, %arg3: memref<2x32x32xbf16, #tpu.memory_space<vmem>>, %arg4: memref<2x32x64xbf16, #tpu.memory_space<vmem>>, %arg5: memref<2x64x32xbf16, #tpu.memory_space<vmem>>, %arg6: memref<24x128xf32, #tpu.memory_space<vmem>>, %arg7: memref<32x128xbf16, #tpu.memory_space<vmem>>, %arg8: memref<2x128xf32, #tpu.memory_space<vmem>>) attributes {dimension_semantics = [#tpu.dimension_semantics<arbitrary>], iteration_bounds = array<i64: 1>, scalar_prefetch = 0 : i64, scratch_operands = 0 : i64, tpu.core_type = #tpu.core_type<tc>, window_params = [{pipeline_mode = #tpu.pipeline_mode<synchronous>, transform_indices = @transform_0, window_bounds = array<i64: 16, 32>}, {pipeline_mode = #tpu.pipeline_mode<synchronous>, transform_indices = @transform_1, window_bounds = array<i64: 2, 32, 96>}, {pipeline_mode = #tpu.pipeline_mode<synchronous>, transform_indices = @transform_2, window_bounds = array<i64: 2, 32, 32>}, {pipeline_mode = #tpu.pipeline_mode<synchronous>, transform_indices = @transform_3, window_bounds = array<i64: 2, 32, 64>}, {pipeline_mode = #tpu.pipeline_mode<synchronous>, transform_indices = @transform_4, window_bounds = array<i64: 2, 64, 32>}, {pipeline_mode = #tpu.pipeline_mode<synchronous>, transform_indices = @transform_5, window_bounds = array<i64: 24, 128>}, {pipeline_mode = #tpu.pipeline_mode<synchronous>, transform_indices = @transform_6, window_bounds = array<i64: 32, 128>}, {pipeline_mode = #tpu.pipeline_mode<synchronous>, transform_indices = @transform_7, window_bounds = array<i64: 2, 128>}]} {
    %c0 = arith.constant 0 : index
    %c0_0 = arith.constant 0 : index
    %0 = vector.load %arg1[%c0, %c0_0] : memref<16x32xf32, #tpu.memory_space<vmem>>, vector<16x32xf32>
    %c0_1 = arith.constant 0 : index
    %c0_2 = arith.constant 0 : index
    %1 = vector.load %arg6[%c0_1, %c0_2] : memref<24x128xf32, #tpu.memory_space<vmem>>, vector<24x128xf32>
    %2 = tpu.iota {dimensions = array<i32: 0>} : vector<16x16xi32>
    %3 = tpu.iota {dimensions = array<i32: 1>} : vector<16x16xi32>
    %c0_i32 = arith.constant 0 : i32
    %4 = vector.broadcast %c0_i32 : i32 to vector<16x16xi32>
    %5 = arith.cmpi sge, %2, %4 : vector<16x16xi32>
    %c8_i32 = arith.constant 8 : i32
    %6 = vector.broadcast %c8_i32 : i32 to vector<16x16xi32>
    %7 = arith.cmpi slt, %2, %6 : vector<16x16xi32>
    %8 = arith.andi %5, %7 : vector<16x16xi1>
    %c0_i32_3 = arith.constant 0 : i32
    %9 = vector.broadcast %c0_i32_3 : i32 to vector<16x16xi32>
    %10 = arith.cmpi sge, %3, %9 : vector<16x16xi32>
    %11 = arith.andi %8, %10 : vector<16x16xi1>
    %c8_i32_4 = arith.constant 8 : i32
    %12 = vector.broadcast %c8_i32_4 : i32 to vector<16x16xi32>
    %13 = arith.cmpi slt, %3, %12 : vector<16x16xi32>
    %14 = arith.andi %11, %13 : vector<16x16xi1>
    %c8_i32_5 = arith.constant 8 : i32
    %15 = vector.broadcast %c8_i32_5 : i32 to vector<16x16xi32>
    %16 = arith.cmpi sge, %2, %15 : vector<16x16xi32>
    %c16_i32 = arith.constant 16 : i32
    %17 = vector.broadcast %c16_i32 : i32 to vector<16x16xi32>
    %18 = arith.cmpi slt, %2, %17 : vector<16x16xi32>
    %19 = arith.andi %16, %18 : vector<16x16xi1>
    %c8_i32_6 = arith.constant 8 : i32
    %20 = vector.broadcast %c8_i32_6 : i32 to vector<16x16xi32>
    %21 = arith.cmpi sge, %3, %20 : vector<16x16xi32>
    %22 = arith.andi %19, %21 : vector<16x16xi1>
    %c16_i32_7 = arith.constant 16 : i32
    %23 = vector.broadcast %c16_i32_7 : i32 to vector<16x16xi32>
    %24 = arith.cmpi slt, %3, %23 : vector<16x16xi32>
    %25 = arith.andi %22, %24 : vector<16x16xi1>
    %26 = arith.ori %14, %25 : vector<16x16xi1>
    %cst = arith.constant 0.000000e+00 : f32
    %cst_8 = arith.constant -1.000000e+30 : f32
    %27 = vector.broadcast %cst : f32 to vector<16x16xf32>
    %28 = vector.broadcast %cst_8 : f32 to vector<16x16xf32>
    %29 = arith.select %26, %27, %28 : vector<16x16xi1>, vector<16x16xf32>
    %30 = vector.extract_strided_slice %1 {offsets = [0, 0], sizes = [1, 96], strides = [1, 1]} : vector<24x128xf32> to vector<1x96xf32>
    %31 = vector.extract_strided_slice %1 {offsets = [1, 0], sizes = [1, 64], strides = [1, 1]} : vector<24x128xf32> to vector<1x64xf32>
    %32 = vector.extract_strided_slice %1 {offsets = [2, 0], sizes = [1, 32], strides = [1, 1]} : vector<24x128xf32> to vector<1x32xf32>
    %33 = vector.extract_strided_slice %1 {offsets = [3, 0], sizes = [1, 32], strides = [1, 1]} : vector<24x128xf32> to vector<1x32xf32>
    %34 = vector.extract_strided_slice %1 {offsets = [4, 0], sizes = [1, 32], strides = [1, 1]} : vector<24x128xf32> to vector<1x32xf32>
    %35 = vector.extract_strided_slice %1 {offsets = [5, 0], sizes = [1, 32], strides = [1, 1]} : vector<24x128xf32> to vector<1x32xf32>
    %36 = vector.extract_strided_slice %1 {offsets = [6, 0], sizes = [1, 32], strides = [1, 1]} : vector<24x128xf32> to vector<1x32xf32>
    %37 = vector.extract_strided_slice %1 {offsets = [7, 0], sizes = [1, 32], strides = [1, 1]} : vector<24x128xf32> to vector<1x32xf32>
    %c0_9 = arith.constant 0 : index
    %c0_10 = arith.constant 0 : index
    %c0_11 = arith.constant 0 : index
    %38 = vector.load %arg2[%c0_9, %c0_10, %c0_11] : memref<2x32x96xbf16, #tpu.memory_space<vmem>>, vector<1x32x96xbf16>
    %39 = vector.shape_cast %38 : vector<1x32x96xbf16> to vector<32x96xbf16>
    %40 = arith.truncf %0 : vector<16x32xf32> to vector<16x32xbf16>
    %cst_12 = arith.constant dense<0.000000e+00> : vector<16x96xf32>
    %41 = tpu.matmul %40, %39, %cst_12 {dimension_numbers = #tpu.dot_dimension_numbers<[1], [0], [0], [1], [0, 0, 1, 1], [], []>} : vector<16x32xbf16>, vector<32x96xbf16>, vector<16x96xf32> -> vector<16x96xf32>
    %42 = vector.broadcast %30 : vector<1x96xf32> to vector<16x96xf32>
    %43 = arith.addf %41, %42 : vector<16x96xf32>
    %44 = vector.extract_strided_slice %43 {offsets = [0, 0], sizes = [16, 16], strides = [1, 1]} : vector<16x96xf32> to vector<16x16xf32>
    %45 = vector.extract_strided_slice %43 {offsets = [0, 32], sizes = [16, 16], strides = [1, 1]} : vector<16x96xf32> to vector<16x16xf32>
    %46 = vector.extract_strided_slice %43 {offsets = [0, 64], sizes = [16, 16], strides = [1, 1]} : vector<16x96xf32> to vector<16x16xf32>
    %cst_13 = arith.constant dense<0.000000e+00> : vector<16x16xf32>
    %47 = tpu.matmul %44, %45, %cst_13 {dimension_numbers = #tpu.dot_dimension_numbers<[1], [1], [0], [0], [0, 0, 1, 0], [], []>} : vector<16x16xf32>, vector<16x16xf32>, vector<16x16xf32> -> vector<16x16xf32>
    %48 = arith.addf %47, %29 : vector<16x16xf32>
    %cst_14 = arith.constant dense<0xFF800000> : vector<16xf32>
    %49 = vector.multi_reduction <maximumf>, %48, %cst_14 [1] : vector<16x16xf32> to vector<16xf32>
    %50 = vector.shape_cast %49 : vector<16xf32> to vector<16x1xf32>
    %51 = vector.broadcast %50 : vector<16x1xf32> to vector<16x16xf32>
    %52 = arith.subf %48, %51 : vector<16x16xf32>
    %53 = math.exp %52 : vector<16x16xf32>
    %cst_15 = arith.constant dense<0.000000e+00> : vector<16xf32>
    %54 = vector.multi_reduction <add>, %53, %cst_15 [1] : vector<16x16xf32> to vector<16xf32>
    %55 = vector.shape_cast %54 : vector<16xf32> to vector<16x1xf32>
    %56 = tpu.reciprocal %55 {approx = true} : vector<16x1xf32> -> vector<16x1xf32>
    %57 = vector.broadcast %56 : vector<16x1xf32> to vector<16x16xf32>
    %58 = arith.mulf %53, %57 : vector<16x16xf32>
    %cst_16 = arith.constant dense<0.000000e+00> : vector<16x16xf32>
    %59 = tpu.matmul %58, %46, %cst_16 {dimension_numbers = #tpu.dot_dimension_numbers<[1], [0], [0], [1], [0, 0, 1, 1], [], []>} : vector<16x16xf32>, vector<16x16xf32>, vector<16x16xf32> -> vector<16x16xf32>
    %60 = vector.extract_strided_slice %43 {offsets = [0, 16], sizes = [16, 16], strides = [1, 1]} : vector<16x96xf32> to vector<16x16xf32>
    %61 = vector.extract_strided_slice %43 {offsets = [0, 48], sizes = [16, 16], strides = [1, 1]} : vector<16x96xf32> to vector<16x16xf32>
    %62 = vector.extract_strided_slice %43 {offsets = [0, 80], sizes = [16, 16], strides = [1, 1]} : vector<16x96xf32> to vector<16x16xf32>
    %cst_17 = arith.constant dense<0.000000e+00> : vector<16x16xf32>
    %63 = tpu.matmul %60, %61, %cst_17 {dimension_numbers = #tpu.dot_dimension_numbers<[1], [1], [0], [0], [0, 0, 1, 0], [], []>} : vector<16x16xf32>, vector<16x16xf32>, vector<16x16xf32> -> vector<16x16xf32>
    %64 = arith.addf %63, %29 : vector<16x16xf32>
    %cst_18 = arith.constant dense<0xFF800000> : vector<16xf32>
    %65 = vector.multi_reduction <maximumf>, %64, %cst_18 [1] : vector<16x16xf32> to vector<16xf32>
    %66 = vector.shape_cast %65 : vector<16xf32> to vector<16x1xf32>
    %67 = vector.broadcast %66 : vector<16x1xf32> to vector<16x16xf32>
    %68 = arith.subf %64, %67 : vector<16x16xf32>
    %69 = math.exp %68 : vector<16x16xf32>
    %cst_19 = arith.constant dense<0.000000e+00> : vector<16xf32>
    %70 = vector.multi_reduction <add>, %69, %cst_19 [1] : vector<16x16xf32> to vector<16xf32>
    %71 = vector.shape_cast %70 : vector<16xf32> to vector<16x1xf32>
    %72 = tpu.reciprocal %71 {approx = true} : vector<16x1xf32> -> vector<16x1xf32>
    %73 = vector.broadcast %72 : vector<16x1xf32> to vector<16x16xf32>
    %74 = arith.mulf %69, %73 : vector<16x16xf32>
    %cst_20 = arith.constant dense<0.000000e+00> : vector<16x16xf32>
    %75 = tpu.matmul %74, %62, %cst_20 {dimension_numbers = #tpu.dot_dimension_numbers<[1], [0], [0], [1], [0, 0, 1, 1], [], []>} : vector<16x16xf32>, vector<16x16xf32>, vector<16x16xf32> -> vector<16x16xf32>
    %76 = tpu.concatenate %59, %75 in 1 : vector<16x16xf32>, vector<16x16xf32> -> vector<16x32xf32>
    %c0_21 = arith.constant 0 : index
    %c0_22 = arith.constant 0 : index
    %c0_23 = arith.constant 0 : index
    %77 = vector.load %arg3[%c0_21, %c0_22, %c0_23] : memref<2x32x32xbf16, #tpu.memory_space<vmem>>, vector<1x32x32xbf16>
    %78 = vector.shape_cast %77 : vector<1x32x32xbf16> to vector<32x32xbf16>
    %79 = arith.truncf %76 : vector<16x32xf32> to vector<16x32xbf16>
    %cst_24 = arith.constant dense<0.000000e+00> : vector<16x32xf32>
    %80 = tpu.matmul %79, %78, %cst_24 {dimension_numbers = #tpu.dot_dimension_numbers<[1], [0], [0], [1], [0, 0, 1, 1], [], []>} : vector<16x32xbf16>, vector<32x32xbf16>, vector<16x32xf32> -> vector<16x32xf32>
    %81 = vector.broadcast %32 : vector<1x32xf32> to vector<16x32xf32>
    %82 = arith.addf %80, %81 : vector<16x32xf32>
    %83 = arith.addf %0, %82 : vector<16x32xf32>
    %cst_25 = arith.constant dense<0.000000e+00> : vector<16xf32>
    %84 = vector.multi_reduction <add>, %83, %cst_25 [1] : vector<16x32xf32> to vector<16xf32>
    %85 = vector.shape_cast %84 : vector<16xf32> to vector<16x1xf32>
    %cst_26 = arith.constant 3.200000e+01 : f32
    %86 = vector.broadcast %cst_26 : f32 to vector<16x1xf32>
    %87 = arith.divf %85, %86 : vector<16x1xf32>
    %88 = vector.broadcast %87 : vector<16x1xf32> to vector<16x32xf32>
    %89 = arith.subf %83, %88 : vector<16x32xf32>
    %90 = arith.mulf %89, %89 : vector<16x32xf32>
    %cst_27 = arith.constant dense<0.000000e+00> : vector<16xf32>
    %91 = vector.multi_reduction <add>, %90, %cst_27 [1] : vector<16x32xf32> to vector<16xf32>
    %92 = vector.shape_cast %91 : vector<16xf32> to vector<16x1xf32>
    %cst_28 = arith.constant 3.200000e+01 : f32
    %93 = vector.broadcast %cst_28 : f32 to vector<16x1xf32>
    %94 = arith.divf %92, %93 : vector<16x1xf32>
    %95 = vector.broadcast %87 : vector<16x1xf32> to vector<16x32xf32>
    %96 = arith.subf %83, %95 : vector<16x32xf32>
    %cst_29 = arith.constant 9.99999996E-13 : f32
    %97 = vector.broadcast %cst_29 : f32 to vector<16x1xf32>
    %98 = arith.addf %94, %97 : vector<16x1xf32>
    %99 = math.rsqrt %98 : vector<16x1xf32>
    %100 = vector.broadcast %99 : vector<16x1xf32> to vector<16x32xf32>
    %101 = arith.mulf %96, %100 : vector<16x32xf32>
    %102 = vector.broadcast %33 : vector<1x32xf32> to vector<16x32xf32>
    %103 = arith.mulf %101, %102 : vector<16x32xf32>
    %104 = vector.broadcast %34 : vector<1x32xf32> to vector<16x32xf32>
    %105 = arith.addf %103, %104 : vector<16x32xf32>
    %c0_30 = arith.constant 0 : index
    %c0_31 = arith.constant 0 : index
    %c0_32 = arith.constant 0 : index
    %106 = vector.load %arg4[%c0_30, %c0_31, %c0_32] : memref<2x32x64xbf16, #tpu.memory_space<vmem>>, vector<1x32x64xbf16>
    %107 = vector.shape_cast %106 : vector<1x32x64xbf16> to vector<32x64xbf16>
    %108 = arith.truncf %105 : vector<16x32xf32> to vector<16x32xbf16>
    %cst_33 = arith.constant dense<0.000000e+00> : vector<16x64xf32>
    %109 = tpu.matmul %108, %107, %cst_33 {dimension_numbers = #tpu.dot_dimension_numbers<[1], [0], [0], [1], [0, 0, 1, 1], [], []>} : vector<16x32xbf16>, vector<32x64xbf16>, vector<16x64xf32> -> vector<16x64xf32>
    %110 = vector.broadcast %31 : vector<1x64xf32> to vector<16x64xf32>
    %111 = arith.addf %109, %110 : vector<16x64xf32>
    %112 = arith.mulf %111, %111 : vector<16x64xf32>
    %113 = arith.mulf %111, %112 : vector<16x64xf32>
    %cst_34 = arith.constant 4.471500e-02 : f32
    %114 = vector.broadcast %cst_34 : f32 to vector<16x64xf32>
    %115 = arith.mulf %114, %113 : vector<16x64xf32>
    %116 = arith.addf %111, %115 : vector<16x64xf32>
    %cst_35 = arith.constant 0.797884583 : f32
    %117 = vector.broadcast %cst_35 : f32 to vector<16x64xf32>
    %118 = arith.mulf %117, %116 : vector<16x64xf32>
    %119 = math.tanh %118 : vector<16x64xf32>
    %cst_36 = arith.constant 1.000000e+00 : f32
    %120 = vector.broadcast %cst_36 : f32 to vector<16x64xf32>
    %121 = arith.addf %120, %119 : vector<16x64xf32>
    %cst_37 = arith.constant 5.000000e-01 : f32
    %122 = vector.broadcast %cst_37 : f32 to vector<16x64xf32>
    %123 = arith.mulf %122, %121 : vector<16x64xf32>
    %124 = arith.mulf %111, %123 : vector<16x64xf32>
    %c0_38 = arith.constant 0 : index
    %c0_39 = arith.constant 0 : index
    %c0_40 = arith.constant 0 : index
    %125 = vector.load %arg5[%c0_38, %c0_39, %c0_40] : memref<2x64x32xbf16, #tpu.memory_space<vmem>>, vector<1x64x32xbf16>
    %126 = vector.shape_cast %125 : vector<1x64x32xbf16> to vector<64x32xbf16>
    %127 = arith.truncf %124 : vector<16x64xf32> to vector<16x64xbf16>
    %cst_41 = arith.constant dense<0.000000e+00> : vector<16x32xf32>
    %128 = tpu.matmul %127, %126, %cst_41 {dimension_numbers = #tpu.dot_dimension_numbers<[1], [0], [0], [1], [0, 0, 1, 1], [], []>} : vector<16x64xbf16>, vector<64x32xbf16>, vector<16x32xf32> -> vector<16x32xf32>
    %129 = vector.broadcast %35 : vector<1x32xf32> to vector<16x32xf32>
    %130 = arith.addf %128, %129 : vector<16x32xf32>
    %131 = arith.addf %105, %130 : vector<16x32xf32>
    %cst_42 = arith.constant dense<0.000000e+00> : vector<16xf32>
    %132 = vector.multi_reduction <add>, %131, %cst_42 [1] : vector<16x32xf32> to vector<16xf32>
    %133 = vector.shape_cast %132 : vector<16xf32> to vector<16x1xf32>
    %cst_43 = arith.constant 3.200000e+01 : f32
    %134 = vector.broadcast %cst_43 : f32 to vector<16x1xf32>
    %135 = arith.divf %133, %134 : vector<16x1xf32>
    %136 = vector.broadcast %135 : vector<16x1xf32> to vector<16x32xf32>
    %137 = arith.subf %131, %136 : vector<16x32xf32>
    %138 = arith.mulf %137, %137 : vector<16x32xf32>
    %cst_44 = arith.constant dense<0.000000e+00> : vector<16xf32>
    %139 = vector.multi_reduction <add>, %138, %cst_44 [1] : vector<16x32xf32> to vector<16xf32>
    %140 = vector.shape_cast %139 : vector<16xf32> to vector<16x1xf32>
    %cst_45 = arith.constant 3.200000e+01 : f32
    %141 = vector.broadcast %cst_45 : f32 to vector<16x1xf32>
    %142 = arith.divf %140, %141 : vector<16x1xf32>
    %143 = vector.broadcast %135 : vector<16x1xf32> to vector<16x32xf32>
    %144 = arith.subf %131, %143 : vector<16x32xf32>
    %cst_46 = arith.constant 9.99999996E-13 : f32
    %145 = vector.broadcast %cst_46 : f32 to vector<16x1xf32>
    %146 = arith.addf %142, %145 : vector<16x1xf32>
    %147 = math.rsqrt %146 : vector<16x1xf32>
    %148 = vector.broadcast %147 : vector<16x1xf32> to vector<16x32xf32>
    %149 = arith.mulf %144, %148 : vector<16x32xf32>
    %150 = vector.broadcast %36 : vector<1x32xf32> to vector<16x32xf32>
    %151 = arith.mulf %149, %150 : vector<16x32xf32>
    %152 = vector.broadcast %37 : vector<1x32xf32> to vector<16x32xf32>
    %153 = arith.addf %151, %152 : vector<16x32xf32>
    %154 = vector.extract_strided_slice %1 {offsets = [8, 0], sizes = [1, 96], strides = [1, 1]} : vector<24x128xf32> to vector<1x96xf32>
    %155 = vector.extract_strided_slice %1 {offsets = [9, 0], sizes = [1, 64], strides = [1, 1]} : vector<24x128xf32> to vector<1x64xf32>
    %156 = vector.extract_strided_slice %1 {offsets = [10, 0], sizes = [1, 32], strides = [1, 1]} : vector<24x128xf32> to vector<1x32xf32>
    %157 = vector.extract_strided_slice %1 {offsets = [11, 0], sizes = [1, 32], strides = [1, 1]} : vector<24x128xf32> to vector<1x32xf32>
    %158 = vector.extract_strided_slice %1 {offsets = [12, 0], sizes = [1, 32], strides = [1, 1]} : vector<24x128xf32> to vector<1x32xf32>
    %159 = vector.extract_strided_slice %1 {offsets = [13, 0], sizes = [1, 32], strides = [1, 1]} : vector<24x128xf32> to vector<1x32xf32>
    %160 = vector.extract_strided_slice %1 {offsets = [14, 0], sizes = [1, 32], strides = [1, 1]} : vector<24x128xf32> to vector<1x32xf32>
    %161 = vector.extract_strided_slice %1 {offsets = [15, 0], sizes = [1, 32], strides = [1, 1]} : vector<24x128xf32> to vector<1x32xf32>
    %c1 = arith.constant 1 : index
    %c0_47 = arith.constant 0 : index
    %c0_48 = arith.constant 0 : index
    %162 = vector.load %arg2[%c1, %c0_47, %c0_48] : memref<2x32x96xbf16, #tpu.memory_space<vmem>>, vector<1x32x96xbf16>
    %163 = vector.shape_cast %162 : vector<1x32x96xbf16> to vector<32x96xbf16>
    %164 = arith.truncf %153 : vector<16x32xf32> to vector<16x32xbf16>
    %cst_49 = arith.constant dense<0.000000e+00> : vector<16x96xf32>
    %165 = tpu.matmul %164, %163, %cst_49 {dimension_numbers = #tpu.dot_dimension_numbers<[1], [0], [0], [1], [0, 0, 1, 1], [], []>} : vector<16x32xbf16>, vector<32x96xbf16>, vector<16x96xf32> -> vector<16x96xf32>
    %166 = vector.broadcast %154 : vector<1x96xf32> to vector<16x96xf32>
    %167 = arith.addf %165, %166 : vector<16x96xf32>
    %168 = vector.extract_strided_slice %167 {offsets = [0, 0], sizes = [16, 16], strides = [1, 1]} : vector<16x96xf32> to vector<16x16xf32>
    %169 = vector.extract_strided_slice %167 {offsets = [0, 32], sizes = [16, 16], strides = [1, 1]} : vector<16x96xf32> to vector<16x16xf32>
    %170 = vector.extract_strided_slice %167 {offsets = [0, 64], sizes = [16, 16], strides = [1, 1]} : vector<16x96xf32> to vector<16x16xf32>
    %cst_50 = arith.constant dense<0.000000e+00> : vector<16x16xf32>
    %171 = tpu.matmul %168, %169, %cst_50 {dimension_numbers = #tpu.dot_dimension_numbers<[1], [1], [0], [0], [0, 0, 1, 0], [], []>} : vector<16x16xf32>, vector<16x16xf32>, vector<16x16xf32> -> vector<16x16xf32>
    %172 = arith.addf %171, %29 : vector<16x16xf32>
    %cst_51 = arith.constant dense<0xFF800000> : vector<16xf32>
    %173 = vector.multi_reduction <maximumf>, %172, %cst_51 [1] : vector<16x16xf32> to vector<16xf32>
    %174 = vector.shape_cast %173 : vector<16xf32> to vector<16x1xf32>
    %175 = vector.broadcast %174 : vector<16x1xf32> to vector<16x16xf32>
    %176 = arith.subf %172, %175 : vector<16x16xf32>
    %177 = math.exp %176 : vector<16x16xf32>
    %cst_52 = arith.constant dense<0.000000e+00> : vector<16xf32>
    %178 = vector.multi_reduction <add>, %177, %cst_52 [1] : vector<16x16xf32> to vector<16xf32>
    %179 = vector.shape_cast %178 : vector<16xf32> to vector<16x1xf32>
    %180 = tpu.reciprocal %179 {approx = true} : vector<16x1xf32> -> vector<16x1xf32>
    %181 = vector.broadcast %180 : vector<16x1xf32> to vector<16x16xf32>
    %182 = arith.mulf %177, %181 : vector<16x16xf32>
    %cst_53 = arith.constant dense<0.000000e+00> : vector<16x16xf32>
    %183 = tpu.matmul %182, %170, %cst_53 {dimension_numbers = #tpu.dot_dimension_numbers<[1], [0], [0], [1], [0, 0, 1, 1], [], []>} : vector<16x16xf32>, vector<16x16xf32>, vector<16x16xf32> -> vector<16x16xf32>
    %184 = vector.extract_strided_slice %167 {offsets = [0, 16], sizes = [16, 16], strides = [1, 1]} : vector<16x96xf32> to vector<16x16xf32>
    %185 = vector.extract_strided_slice %167 {offsets = [0, 48], sizes = [16, 16], strides = [1, 1]} : vector<16x96xf32> to vector<16x16xf32>
    %186 = vector.extract_strided_slice %167 {offsets = [0, 80], sizes = [16, 16], strides = [1, 1]} : vector<16x96xf32> to vector<16x16xf32>
    %cst_54 = arith.constant dense<0.000000e+00> : vector<16x16xf32>
    %187 = tpu.matmul %184, %185, %cst_54 {dimension_numbers = #tpu.dot_dimension_numbers<[1], [1], [0], [0], [0, 0, 1, 0], [], []>} : vector<16x16xf32>, vector<16x16xf32>, vector<16x16xf32> -> vector<16x16xf32>
    %188 = arith.addf %187, %29 : vector<16x16xf32>
    %cst_55 = arith.constant dense<0xFF800000> : vector<16xf32>
    %189 = vector.multi_reduction <maximumf>, %188, %cst_55 [1] : vector<16x16xf32> to vector<16xf32>
    %190 = vector.shape_cast %189 : vector<16xf32> to vector<16x1xf32>
    %191 = vector.broadcast %190 : vector<16x1xf32> to vector<16x16xf32>
    %192 = arith.subf %188, %191 : vector<16x16xf32>
    %193 = math.exp %192 : vector<16x16xf32>
    %cst_56 = arith.constant dense<0.000000e+00> : vector<16xf32>
    %194 = vector.multi_reduction <add>, %193, %cst_56 [1] : vector<16x16xf32> to vector<16xf32>
    %195 = vector.shape_cast %194 : vector<16xf32> to vector<16x1xf32>
    %196 = tpu.reciprocal %195 {approx = true} : vector<16x1xf32> -> vector<16x1xf32>
    %197 = vector.broadcast %196 : vector<16x1xf32> to vector<16x16xf32>
    %198 = arith.mulf %193, %197 : vector<16x16xf32>
    %cst_57 = arith.constant dense<0.000000e+00> : vector<16x16xf32>
    %199 = tpu.matmul %198, %186, %cst_57 {dimension_numbers = #tpu.dot_dimension_numbers<[1], [0], [0], [1], [0, 0, 1, 1], [], []>} : vector<16x16xf32>, vector<16x16xf32>, vector<16x16xf32> -> vector<16x16xf32>
    %200 = tpu.concatenate %183, %199 in 1 : vector<16x16xf32>, vector<16x16xf32> -> vector<16x32xf32>
    %c1_58 = arith.constant 1 : index
    %c0_59 = arith.constant 0 : index
    %c0_60 = arith.constant 0 : index
    %201 = vector.load %arg3[%c1_58, %c0_59, %c0_60] : memref<2x32x32xbf16, #tpu.memory_space<vmem>>, vector<1x32x32xbf16>
    %202 = vector.shape_cast %201 : vector<1x32x32xbf16> to vector<32x32xbf16>
    %203 = arith.truncf %200 : vector<16x32xf32> to vector<16x32xbf16>
    %cst_61 = arith.constant dense<0.000000e+00> : vector<16x32xf32>
    %204 = tpu.matmul %203, %202, %cst_61 {dimension_numbers = #tpu.dot_dimension_numbers<[1], [0], [0], [1], [0, 0, 1, 1], [], []>} : vector<16x32xbf16>, vector<32x32xbf16>, vector<16x32xf32> -> vector<16x32xf32>
    %205 = vector.broadcast %156 : vector<1x32xf32> to vector<16x32xf32>
    %206 = arith.addf %204, %205 : vector<16x32xf32>
    %207 = arith.addf %153, %206 : vector<16x32xf32>
    %cst_62 = arith.constant dense<0.000000e+00> : vector<16xf32>
    %208 = vector.multi_reduction <add>, %207, %cst_62 [1] : vector<16x32xf32> to vector<16xf32>
    %209 = vector.shape_cast %208 : vector<16xf32> to vector<16x1xf32>
    %cst_63 = arith.constant 3.200000e+01 : f32
    %210 = vector.broadcast %cst_63 : f32 to vector<16x1xf32>
    %211 = arith.divf %209, %210 : vector<16x1xf32>
    %212 = vector.broadcast %211 : vector<16x1xf32> to vector<16x32xf32>
    %213 = arith.subf %207, %212 : vector<16x32xf32>
    %214 = arith.mulf %213, %213 : vector<16x32xf32>
    %cst_64 = arith.constant dense<0.000000e+00> : vector<16xf32>
    %215 = vector.multi_reduction <add>, %214, %cst_64 [1] : vector<16x32xf32> to vector<16xf32>
    %216 = vector.shape_cast %215 : vector<16xf32> to vector<16x1xf32>
    %cst_65 = arith.constant 3.200000e+01 : f32
    %217 = vector.broadcast %cst_65 : f32 to vector<16x1xf32>
    %218 = arith.divf %216, %217 : vector<16x1xf32>
    %219 = vector.broadcast %211 : vector<16x1xf32> to vector<16x32xf32>
    %220 = arith.subf %207, %219 : vector<16x32xf32>
    %cst_66 = arith.constant 9.99999996E-13 : f32
    %221 = vector.broadcast %cst_66 : f32 to vector<16x1xf32>
    %222 = arith.addf %218, %221 : vector<16x1xf32>
    %223 = math.rsqrt %222 : vector<16x1xf32>
    %224 = vector.broadcast %223 : vector<16x1xf32> to vector<16x32xf32>
    %225 = arith.mulf %220, %224 : vector<16x32xf32>
    %226 = vector.broadcast %157 : vector<1x32xf32> to vector<16x32xf32>
    %227 = arith.mulf %225, %226 : vector<16x32xf32>
    %228 = vector.broadcast %158 : vector<1x32xf32> to vector<16x32xf32>
    %229 = arith.addf %227, %228 : vector<16x32xf32>
    %c1_67 = arith.constant 1 : index
    %c0_68 = arith.constant 0 : index
    %c0_69 = arith.constant 0 : index
    %230 = vector.load %arg4[%c1_67, %c0_68, %c0_69] : memref<2x32x64xbf16, #tpu.memory_space<vmem>>, vector<1x32x64xbf16>
    %231 = vector.shape_cast %230 : vector<1x32x64xbf16> to vector<32x64xbf16>
    %232 = arith.truncf %229 : vector<16x32xf32> to vector<16x32xbf16>
    %cst_70 = arith.constant dense<0.000000e+00> : vector<16x64xf32>
    %233 = tpu.matmul %232, %231, %cst_70 {dimension_numbers = #tpu.dot_dimension_numbers<[1], [0], [0], [1], [0, 0, 1, 1], [], []>} : vector<16x32xbf16>, vector<32x64xbf16>, vector<16x64xf32> -> vector<16x64xf32>
    %234 = vector.broadcast %155 : vector<1x64xf32> to vector<16x64xf32>
    %235 = arith.addf %233, %234 : vector<16x64xf32>
    %236 = arith.mulf %235, %235 : vector<16x64xf32>
    %237 = arith.mulf %235, %236 : vector<16x64xf32>
    %cst_71 = arith.constant 4.471500e-02 : f32
    %238 = vector.broadcast %cst_71 : f32 to vector<16x64xf32>
    %239 = arith.mulf %238, %237 : vector<16x64xf32>
    %240 = arith.addf %235, %239 : vector<16x64xf32>
    %cst_72 = arith.constant 0.797884583 : f32
    %241 = vector.broadcast %cst_72 : f32 to vector<16x64xf32>
    %242 = arith.mulf %241, %240 : vector<16x64xf32>
    %243 = math.tanh %242 : vector<16x64xf32>
    %cst_73 = arith.constant 1.000000e+00 : f32
    %244 = vector.broadcast %cst_73 : f32 to vector<16x64xf32>
    %245 = arith.addf %244, %243 : vector<16x64xf32>
    %cst_74 = arith.constant 5.000000e-01 : f32
    %246 = vector.broadcast %cst_74 : f32 to vector<16x64xf32>
    %247 = arith.mulf %246, %245 : vector<16x64xf32>
    %248 = arith.mulf %235, %247 : vector<16x64xf32>
    %c1_75 = arith.constant 1 : index
    %c0_76 = arith.constant 0 : index
    %c0_77 = arith.constant 0 : index
    %249 = vector.load %arg5[%c1_75, %c0_76, %c0_77] : memref<2x64x32xbf16, #tpu.memory_space<vmem>>, vector<1x64x32xbf16>
    %250 = vector.shape_cast %249 : vector<1x64x32xbf16> to vector<64x32xbf16>
    %251 = arith.truncf %248 : vector<16x64xf32> to vector<16x64xbf16>
    %cst_78 = arith.constant dense<0.000000e+00> : vector<16x32xf32>
    %252 = tpu.matmul %251, %250, %cst_78 {dimension_numbers = #tpu.dot_dimension_numbers<[1], [0], [0], [1], [0, 0, 1, 1], [], []>} : vector<16x64xbf16>, vector<64x32xbf16>, vector<16x32xf32> -> vector<16x32xf32>
    %253 = vector.broadcast %159 : vector<1x32xf32> to vector<16x32xf32>
    %254 = arith.addf %252, %253 : vector<16x32xf32>
    %255 = arith.addf %229, %254 : vector<16x32xf32>
    %cst_79 = arith.constant dense<0.000000e+00> : vector<16xf32>
    %256 = vector.multi_reduction <add>, %255, %cst_79 [1] : vector<16x32xf32> to vector<16xf32>
    %257 = vector.shape_cast %256 : vector<16xf32> to vector<16x1xf32>
    %cst_80 = arith.constant 3.200000e+01 : f32
    %258 = vector.broadcast %cst_80 : f32 to vector<16x1xf32>
    %259 = arith.divf %257, %258 : vector<16x1xf32>
    %260 = vector.broadcast %259 : vector<16x1xf32> to vector<16x32xf32>
    %261 = arith.subf %255, %260 : vector<16x32xf32>
    %262 = arith.mulf %261, %261 : vector<16x32xf32>
    %cst_81 = arith.constant dense<0.000000e+00> : vector<16xf32>
    %263 = vector.multi_reduction <add>, %262, %cst_81 [1] : vector<16x32xf32> to vector<16xf32>
    %264 = vector.shape_cast %263 : vector<16xf32> to vector<16x1xf32>
    %cst_82 = arith.constant 3.200000e+01 : f32
    %265 = vector.broadcast %cst_82 : f32 to vector<16x1xf32>
    %266 = arith.divf %264, %265 : vector<16x1xf32>
    %267 = vector.broadcast %259 : vector<16x1xf32> to vector<16x32xf32>
    %268 = arith.subf %255, %267 : vector<16x32xf32>
    %cst_83 = arith.constant 9.99999996E-13 : f32
    %269 = vector.broadcast %cst_83 : f32 to vector<16x1xf32>
    %270 = arith.addf %266, %269 : vector<16x1xf32>
    %271 = math.rsqrt %270 : vector<16x1xf32>
    %272 = vector.broadcast %271 : vector<16x1xf32> to vector<16x32xf32>
    %273 = arith.mulf %268, %272 : vector<16x32xf32>
    %274 = vector.broadcast %160 : vector<1x32xf32> to vector<16x32xf32>
    %275 = arith.mulf %273, %274 : vector<16x32xf32>
    %276 = vector.broadcast %161 : vector<1x32xf32> to vector<16x32xf32>
    %277 = arith.addf %275, %276 : vector<16x32xf32>
    %278 = vector.extract_strided_slice %277 {offsets = [0, 0], sizes = [1, 32], strides = [1, 1]} : vector<16x32xf32> to vector<1x32xf32>
    %279 = vector.extract_strided_slice %277 {offsets = [8, 0], sizes = [1, 32], strides = [1, 1]} : vector<16x32xf32> to vector<1x32xf32>
    %280 = tpu.concatenate %278, %279 in 0 : vector<1x32xf32>, vector<1x32xf32> -> vector<2x32xf32>
    %281 = vector.extract_strided_slice %1 {offsets = [16, 0], sizes = [1, 32], strides = [1, 1]} : vector<24x128xf32> to vector<1x32xf32>
    %282 = vector.extract_strided_slice %1 {offsets = [16, 32], sizes = [1, 2], strides = [1, 1]} : vector<24x128xf32> to vector<1x2xf32>
    %c0_84 = arith.constant 0 : index
    %c0_85 = arith.constant 0 : index
    %283 = vector.load %arg7[%c0_84, %c0_85] : memref<32x128xbf16, #tpu.memory_space<vmem>>, vector<32x128xbf16>
    %284 = vector.extract_strided_slice %283 {offsets = [0, 0], sizes = [32, 32], strides = [1, 1]} : vector<32x128xbf16> to vector<32x32xbf16>
    %285 = vector.extract_strided_slice %283 {offsets = [0, 32], sizes = [32, 2], strides = [1, 1]} : vector<32x128xbf16> to vector<32x2xbf16>
    %286 = arith.truncf %280 : vector<2x32xf32> to vector<2x32xbf16>
    %cst_86 = arith.constant dense<0.000000e+00> : vector<2x32xf32>
    %287 = tpu.matmul %286, %284, %cst_86 {dimension_numbers = #tpu.dot_dimension_numbers<[1], [0], [0], [1], [0, 0, 1, 1], [], []>} : vector<2x32xbf16>, vector<32x32xbf16>, vector<2x32xf32> -> vector<2x32xf32>
    %288 = vector.broadcast %281 : vector<1x32xf32> to vector<2x32xf32>
    %289 = arith.addf %287, %288 : vector<2x32xf32>
    %290 = math.tanh %289 : vector<2x32xf32>
    %291 = arith.truncf %290 : vector<2x32xf32> to vector<2x32xbf16>
    %cst_87 = arith.constant dense<0.000000e+00> : vector<2x2xf32>
    %292 = tpu.matmul %291, %285, %cst_87 {dimension_numbers = #tpu.dot_dimension_numbers<[1], [0], [0], [1], [0, 0, 1, 1], [], []>} : vector<2x32xbf16>, vector<32x2xbf16>, vector<2x2xf32> -> vector<2x2xf32>
    %293 = vector.broadcast %282 : vector<1x2xf32> to vector<2x2xf32>
    %294 = arith.addf %292, %293 : vector<2x2xf32>
    %cst_88 = arith.constant 0.000000e+00 : f32
    %295 = vector.broadcast %cst_88 : f32 to vector<2x94xf32>
    %296 = tpu.concatenate %280, %294, %295 in 1 : vector<2x32xf32>, vector<2x2xf32>, vector<2x94xf32> -> vector<2x128xf32>
    %c0_89 = arith.constant 0 : index
    %c0_90 = arith.constant 0 : index
    %297 = vector.load %arg8[%c0_89, %c0_90] : memref<2x128xf32, #tpu.memory_space<vmem>>, vector<2x128xf32>
    tpu.vector_store %arg8[%c0_89, %c0_90], %296 {strides = array<i32>} : memref<2x128xf32, #tpu.memory_space<vmem>>, vector<2x128xf32>,
    return
  }
  func.func @transform_0(%arg0: i32) -> (i32, i32) {
    %c0_i32 = arith.constant 0 : i32
    %c0_i32_0 = arith.constant 0 : i32
    %c0_i32_1 = arith.constant 0 : i32
    return %c0_i32, %c0_i32_0 : i32, i32
  }
  func.func @transform_1(%arg0: i32) -> (i32, i32, i32) {
    %c0_i32 = arith.constant 0 : i32
    %c0_i32_0 = arith.constant 0 : i32
    %c0_i32_1 = arith.constant 0 : i32
    %c0_i32_2 = arith.constant 0 : i32
    return %c0_i32, %c0_i32_0, %c0_i32_1 : i32, i32, i32
  }
  func.func @transform_2(%arg0: i32) -> (i32, i32, i32) {
    %c0_i32 = arith.constant 0 : i32
    %c0_i32_0 = arith.constant 0 : i32
    %c0_i32_1 = arith.constant 0 : i32
    %c0_i32_2 = arith.constant 0 : i32
    return %c0_i32, %c0_i32_0, %c0_i32_1 : i32, i32, i32
  }
  func.func @transform_3(%arg0: i32) -> (i32, i32, i32) {
    %c0_i32 = arith.constant 0 : i32
    %c0_i32_0 = arith.constant 0 : i32
    %c0_i32_1 = arith.constant 0 : i32
    %c0_i32_2 = arith.constant 0 : i32
    return %c0_i32, %c0_i32_0, %c0_i32_1 : i32, i32, i32
  }
  func.func @transform_4(%arg0: i32) -> (i32, i32, i32) {
    %c0_i32 = arith.constant 0 : i32
    %c0_i32_0 = arith.constant 0 : i32
    %c0_i32_1 = arith.constant 0 : i32
    %c0_i32_2 = arith.constant 0 : i32
    return %c0_i32, %c0_i32_0, %c0_i32_1 : i32, i32, i32
  }
  func.func @transform_5(%arg0: i32) -> (i32, i32) {
    %c0_i32 = arith.constant 0 : i32
    %c0_i32_0 = arith.constant 0 : i32
    %c0_i32_1 = arith.constant 0 : i32
    return %c0_i32, %c0_i32_0 : i32, i32
  }
  func.func @transform_6(%arg0: i32) -> (i32, i32) {
    %c0_i32 = arith.constant 0 : i32
    %c0_i32_0 = arith.constant 0 : i32
    %c0_i32_1 = arith.constant 0 : i32
    return %c0_i32, %c0_i32_0 : i32, i32
  }
  func.func @transform_7(%arg0: i32) -> (i32, i32) {
    %c0_i32 = arith.constant 0 : i32
    %c0_i32_0 = arith.constant 0 : i32
    %c0_i32_1 = arith.constant 0 : i32
    return %c0_i32, %c0_i32_0 : i32, i32
  }
}

</mosaic_0001>

<bundles_post_ra>
// kernel: wrapped_backbone_forward.1
= control target key start
LH: loop header
LB: loop body
LE: loop exit
PB: predicated region body
PF: predicated region fallthrough
CT: control target
= control target key end

     0   :  { %vm83_vm0 = vcmask 261120   ;;  %s1382_s11 = smov 64   ;;  %s1383_s12 = smov 80   ;;  %vm107_vm1 = vcmask 130048   ;;  %v35_v19 = vlaneseq  ;;  %v1385_v21 = vmov -1e+30   ;;  %s1681_s1 = inlined_call_operand.vmem [shape: bf16[2,32,96], index: 1, kind: input, shape index: {}]   ;;  %s1682_s0 = inlined_call_operand.vmem [shape: f32[16,32], index: 0, kind: input, shape index: {}]   ;;  %s1683_s5 = inlined_call_operand.vmem [shape: f32[24,128], index: 5, kind: input, shape index: {}]   ;;  %s1684_s2 = inlined_call_operand.vmem [shape: bf16[2,32,32], index: 2, kind: input, shape index: {}]   ;;  %s1685_s3 = inlined_call_operand.vmem [shape: bf16[2,32,64], index: 3, kind: input, shape index: {}]   ;;  %s1686_s4 = inlined_call_operand.vmem [shape: bf16[2,64,32], index: 4, kind: input, shape index: {}]   ;;  %s1687_s6 = inlined_call_operand.vmem [shape: bf16[32,128], index: 6, kind: input, shape index: {}]   ;;  %s1688_s7 = inlined_call_operand.vmem [shape: f32[2,128], index: 7, kind: output, shape index: {}]  }
   0x1   :  { %v1257_v0 = vld [vmem:[%s1681_s1 + $0x8] sm:$0xff]  ;;  %v1256_v1 = vld [vmem:[%s1681_s1] sm:$0xff]  ;;  %s1384_s13 = smov 112   ;;  %s1386_s14 = smov 48   ;;  %vm483_vm13 = vcmask 523264  }
   0x2   :  { %93 = vmatpush.bf16.msra.mxu0 %v1257_v0  ;;  %v1439_v2 = vld [vmem:[%s1682_s0] sm:$0xff]  ;;  %v1444_v3 = vld [vmem:[%s1682_s0 + $0x8] sm:$0xff]  ;;  %s1381_s0 = smov 96   ;;  %v36_v20 = vand.u32 127, %v35_v19  ;;  %s1387_s17 = smov 16  }
   0x3   :  { %v69_v4 = vpack.c.bf16 %v1444_v3, %v1439_v2  ;;  %v1452_v6 = vld [vmem:[%s1683_s5] sm:$0xff] }
   0x4   :  { %v70_v7 = vperm.slane %v1452_v6, 0  ;;  %vm46_vm2 = vcmp.lt.s32.totalorder %v36_v20, 8  ;;  %vm55_vm3 = vcmp.ge.s32.totalorder %v36_v20, 8  ;;  %vm58_vm4 = vcmp.lt.s32.totalorder %v36_v20, 16 }
   0x5   :  { %v1470_v22 = vsel %vm46_vm2, 0.0, %v1385_v21  ;;  %vm60_vm5 = vmand %vm55_vm3, %vm58_vm4 }
   0x6   :  { %94 = vmatpush.bf16.msra.mxu0 %v1256_v1  ;;  %v1474_v26 = vsel %vm60_vm5, 0.0, %v1385_v21 }
   0x9   :  { %1122 = vmatmul.msk.bf16.vlgmr.msra.gmra.mxu0 %vm83_vm0, %v69_v4 }
  0x86   :  { %v96_v5 = vpop.f32.mrf.mxu0 }
  0x87   :  { %v97_v9 = vadd.f32 %v96_v5, %v70_v7 }
  0x8e   :  { %v98_v8 = vpop.f32.mrf.mxu0 }
  0x8f   :  { %v99_v10 = vadd.f32 %v98_v8, %v70_v7 }
  0x91   :  { %105 = vrot.lane.b32.xlu0 %v99_v10, %s1381_s0  ;;  %v1456_v11 = vpack.i.bf16 %v97_v9, %v99_v10 }
  0x93   :  { %1292 = vrot.lane.b32.xlu2 %v1456_v11, %s1382_s11 }
  0x99   :  { %103 = vrot.lane.b32.xlu0 %v97_v9, %s1381_s0 }
  0x9b   :  { %202 = vrot.lane.b32.xlu2 %v99_v10, %s1383_s12 }
  0xa1   :  { %200 = vrot.lane.b32.xlu0 %v97_v9, %s1383_s12 }
  0xa3   :  { %198 = vrot.lane.b32.xlu2 %v99_v10, %s1384_s13 }
  0xed   :  { %v1293_v12 = vpop.permute.xlu2 %1292 }
  0xee   :  { %v1294_v13 = vunpack.i.l.bf16 %v1293_v12  ;;  %v1295_v14 = vunpack.i.h.bf16 %v1293_v12 }
  0xf0   :  { %187 = vmatpush.msra.mxu2 %v1294_v13  ;;  %1278 = vmatpush.msra.mxu3 %v1294_v13  ;;  %v1259_v13 = vld [vmem:[%s1684_s2 + $0x8] sm:$0xff] }
  0xf1   :  { %329 = vmatpush.bf16.msrb.mxu0 %v1259_v13 }
  0xf2   :  { %188 = vmatpush.msra.mxu2 %v1295_v14  ;;  %1279 = vmatpush.msra.mxu3 %v1295_v14 }
  0xf5   :  { %v203_v15 = vpop.permute.xlu2 %202 }
  0xf6   :  { %1129 = vmatpush.xpose.msk.msrb.mxu3 %vm107_vm1, %v203_v15 }
  0xfd   :  { %v199_v39 = vpop.permute.xlu2 %198 }
 0x103   :  { %v106_v16 = vpop.permute.xlu0 %105 }
 0x104   :  { %1123 = vmatpush.xpose.msk.msra.mxu1 %vm107_vm1, %v106_v16 }
 0x10b   :  { %v104_v17 = vpop.permute.xlu0 %103 }
 0x10c   :  { %1124 = vmatpush.xpose.msk.msra.mxu1 %vm107_vm1, %v104_v17 }
 0x10f   :  { %1125 = vmatmul.msk.f32.vlgmr.msra.gmra.mxu1 %vm107_vm1, %v97_v9 }
 0x113   :  { %v201_v18 = vpop.permute.xlu0 %200 }
 0x114   :  { %1130 = vmatpush.xpose.msk.msrb.mxu3 %vm107_vm1, %v201_v18  ;;  %v1258_v18 = vld [vmem:[%s1684_s2] sm:$0xff] }
 0x115   :  { %330 = vmatpush.bf16.msrb.mxu0 %v1258_v18 }
 0x117   :  { %1126 = vmatmul.msk.f32.gmra.mxu1 %vm107_vm1, %v99_v10 }
 0x18c   :  { %v133_v23 = vpop.f32.mrf.mxu1 }
 0x18d   :  { %v134_v24 = vadd.f32 %v133_v23, %v1470_v22 }
 0x18f   :  { %v139_v25 = vsel %vm107_vm1, %v134_v24, -inf }
 0x190   :  { %140 = vmax.xlane.f32.xlu0 %v139_v25 }
 0x194   :  { %v136_v27 = vpop.f32.mrf.mxu1 }
 0x195   :  { %v137_v28 = vadd.f32 %v136_v27, %v1474_v26  ;;  %v307_v27 = vperm.slane %v1452_v6, 2 }
 0x197   :  { %v142_v29 = vsel %vm107_vm1, %v137_v28, -inf }
 0x198   :  { %143 = vmax.xlane.f32.xlu1 %v142_v29 }
 0x203   :  { %v141_v40 = vpop.xlane.xlu0 %140 }
 0x204   :  { %v145_v42 = vsub.f32 %v134_v24, %v141_v40 }
 0x206   :  { %v147_v43 = vmul.f32 1.442695, %v145_v42 }
 0x20b   :  { %v144_v30 = vpop.xlane.xlu1 %143 }
 0x20c   :  { %v146_v31 = vsub.f32 %v137_v28, %v144_v30 }
 0x20e   :  { %v149_v32 = vmul.f32 1.442695, %v146_v31 }
 0x210   :  { %1321 = vpow2.f32 %v149_v32 }
 0x216   :  { %v1322_v33 = vpop.eup %1321 }
 0x217   :  { %v154_v34 = vsel %vm107_vm1, %v1322_v33, 0.0 }
 0x218   :  { %155 = vadd.xlane.f32.xlu1 %v154_v34 }
 0x231   :  { %196 = vrot.lane.b32.xlu1 %v97_v9, %s1384_s13 }
 0x28b   :  { %v156_v35 = vpop.xlane.xlu1 %155 }
 0x28c   :  { %1323 = vrcp.f32 %v156_v35 }
 0x28d   :  { %1325 = vpow2.f32 %v147_v43 }
 0x292   :  { %v1324_v36 = vpop.eup %1323 }
 0x293   :  { %v160_v37 = vmul.f32 %v1324_v36, %v1322_v33  ;;  %v1326_v47 = vpop.eup %1325  ;;  %v1388_v36 = vmov 32.0  }
 0x294   :  { %v151_v51 = vsel %vm107_vm1, %v1326_v47, 0.0 }
 0x295   :  { %1128 = vmatmul.msk.f32.vlgmr.msra.gmra.mxu3 %vm107_vm1, %v160_v37 }
 0x2a3   :  { %v197_v38 = vpop.permute.xlu1 %196 }
 0x2a4   :  { %1131 = vmatmul.msk.f32.vlgmr.msrb.gmra.mxu3 %vm107_vm1, %v197_v38 }
 0x2ac   :  { %1132 = vmatmul.msk.f32.gmra.mxu3 %vm107_vm1, %v199_v39 }
 0x318   :  { %v1483_v41 = vpop.f32.mrf.mxu3 }
 0x327   :  { %v229_v44 = vpop.f32.mrf.mxu3 }
 0x328   :  { %v230_v45 = vadd.f32 %v229_v44, %v1470_v22 }
 0x32a   :  { %v235_v46 = vsel %vm107_vm1, %v230_v45, -inf }
 0x32b   :  { %236 = vmax.xlane.f32.xlu2 %v235_v46 }
 0x32f   :  { %v232_v48 = vpop.f32.mrf.mxu3 }
 0x330   :  { %v233_v49 = vadd.f32 %v232_v48, %v1474_v26 }
 0x332   :  { %v238_v50 = vsel %vm107_vm1, %v233_v49, -inf }
 0x333   :  { %239 = vmax.xlane.f32.xlu1 %v238_v50  ;;  %152 = vadd.xlane.f32.xlu2 %v151_v51  ;;  %v1261_v51 = vld [vmem:[%s1685_s3 + $0x8] sm:$0xff] }
 0x334   :  { %423 = vmatpush.bf16.msrb.mxu1 %v1261_v51 }
 0x34b   :  { %1297 = vrot.lane.b32.xlu2 %v1456_v11, %s1386_s14 }
 0x39e   :  { %v237_v52 = vpop.xlane.xlu2 %236 }
 0x39f   :  { %v241_v53 = vsub.f32 %v230_v45, %v237_v52 }
 0x3a1   :  { %v243_v54 = vmul.f32 1.442695, %v241_v53  ;;  %v1260_v53 = vld [vmem:[%s1685_s3] sm:$0xff] }
 0x3a2   :  { %424 = vmatpush.bf16.msrb.mxu1 %v1260_v53 }
 0x3a3   :  { %1327 = vpow2.f32 %v243_v54 }
 0x3a6   :  { %v240_v55 = vpop.xlane.xlu1 %239  ;;  %v153_v56 = vpop.xlane.xlu2 %152 }
 0x3a7   :  { %v242_v57 = vsub.f32 %v233_v49, %v240_v55  ;;  %1329 = vrcp.f32 %v153_v56 }
 0x3a9   :  { %v1328_v58 = vpop.eup %1327  ;;  %v245_v59 = vmul.f32 1.442695, %v242_v57 }
 0x3aa   :  { %v247_v60 = vsel %vm107_vm1, %v1328_v58, 0.0 }
 0x3ab   :  { %1331 = vpow2.f32 %v245_v59  ;;  %248 = vadd.xlane.f32.xlu0 %v247_v60 }
 0x3ad   :  { %v1330_v61 = vpop.eup %1329 }
 0x3ae   :  { %v1298_v62 = vpop.permute.xlu2 %1297  ;;  %v159_v63 = vmul.f32 %v1330_v61, %v1326_v47 }
 0x3af   :  { %v1299_v0 = vunpack.i.l.bf16 %v1298_v62  ;;  %v1300_v4 = vunpack.i.h.bf16 %v1298_v62 }
 0x3b0   :  { %1127 = vmatmul.msk.f32.vlgmr.msra.gmra.mxu2 %vm107_vm1, %v159_v63 }
 0x3b1   :  { %v1332_v1 = vpop.eup %1331  ;;  %283 = vmatpush.msrb.mxu2 %v1299_v0 }
 0x3b2   :  { %v250_v5 = vsel %vm107_vm1, %v1332_v1, 0.0 }
 0x3b3   :  { %251 = vadd.xlane.f32.xlu0 %v250_v5  ;;  %284 = vmatpush.msrb.mxu2 %v1300_v4 }
 0x41e   :  { %v249_v7 = vpop.xlane.xlu0 %248 }
 0x41f   :  { %1333 = vrcp.f32 %v249_v7 }
 0x425   :  { %v1334_v8 = vpop.eup %1333 }
 0x426   :  { %v252_v9 = vpop.xlane.xlu0 %251  ;;  %v255_v10 = vmul.f32 %v1334_v8, %v1328_v58 }
 0x427   :  { %1335 = vrcp.f32 %v252_v9 }
 0x428   :  { %1133 = vmatmul.msk.f32.vlgmr.msrb.gmra.mxu2 %vm107_vm1, %v255_v10  ;;  %1337 = vrcp.f32 %v1388_v36 }
 0x42d   :  { %v1336_v11 = vpop.eup %1335 }
 0x42e   :  { %v256_v12 = vmul.f32 %v1336_v11, %v1332_v1  ;;  %v1338_v37 = vpop.eup %1337  ;;  %v390_v11 = vperm.slane %v1452_v6, 3 }
 0x42f   :  { %v346_v38 = vmul.f32 32.0, %v1338_v37  ;;  %vm350_vm6 = vweird.f32 %v1338_v37 }
 0x430   :  { %1134 = vmatmul.msk.f32.gmra.mxu2 %vm107_vm1, %v256_v12 }
 0x431   :  { %v347_v39 = vsub.f32 1.0, %v346_v38 }
 0x433   :  { %v190_v14 = vpop.f32.mrf.mxu2  ;;  %v348_v40 = vmul.f32 %v1338_v37, %v347_v39 }
 0x4ab   :  { %v286_v15 = vpop.f32.mrf.mxu2 }
 0x4b3   :  { %v289_v16 = vpop.f32.mrf.mxu2 }
 0x4b4   :  { %v1301_v17 = vpack.i.bf16 %v289_v16, %v286_v15  ;;  %v393_v16 = vperm.slane %v1452_v6, 4 }
 0x4b6   :  { %1302 = vrot.lane.b32.xlu0 %v1301_v17, %s1387_s17 }
 0x528   :  { %v1303_v19 = vpop.permute.xlu0 %1302 }
 0x529   :  { %v1305_v20 = vunpack.i.h.bf16 %v1303_v19  ;;  %v1304_v21 = vunpack.i.l.bf16 %v1303_v19 }
 0x52b   :  { %v301_v23 = vsel %vm107_vm1, %v1483_v41, %v1305_v20  ;;  %v300_v24 = vsel %vm107_vm1, %v190_v14, %v1304_v21  ;;  %v349_v41 = vadd.f32 %v1338_v37, %v348_v40  ;;  %v1265_v21 = vld [vmem:[%s1686_s4 + $0x18] sm:$0xff] }
 0x52c   :  { %v306_v25 = vpack.c.bf16 %v301_v23, %v300_v24  ;;  %491 = vmatpush.bf16.msra.mxu3 %v1265_v21  ;;  %v1264_v23 = vld [vmem:[%s1686_s4 + $0x10] sm:$0xff]  ;;  %v1263_v24 = vld [vmem:[%s1686_s4 + $0x8] sm:$0xff] }
 0x52d   :  { %v1513_v42 = vsel %vm350_vm6, %v1338_v37, %v349_v41 }
 0x52e   :  { %1143 = vmatmul.msk.bf16.vlgmr.msrb.gmra.mxu0 %vm83_vm0, %v306_v25  ;;  %v401_v25 = vperm.slane %v1452_v6, 1 }
 0x530   :  { %492 = vmatpush.bf16.msra.mxu3 %v1264_v23 }
 0x534   :  { %493 = vmatpush.bf16.msra.mxu3 %v1263_v24 }
 0x5ab   :  { %v332_v28 = vpop.f32.mrf.mxu0 }
 0x5ac   :  { %v333_v29 = vadd.f32 %v332_v28, %v307_v27 }
 0x5ae   :  { %v337_v30 = vadd.f32 %v333_v29, %v1439_v2 }
 0x5b0   :  { %v339_v31 = vsel %vm83_vm0, %v337_v30, 0.0 }
 0x5b1   :  { %340 = vadd.xlane.f32.xlu1 %v339_v31 }
 0x5b3   :  { %v334_v32 = vpop.f32.mrf.mxu0 }
 0x5b4   :  { %v335_v33 = vadd.f32 %v334_v32, %v307_v27  ;;  %v1262_v27 = vld [vmem:[%s1686_s4] sm:$0xff] }
 0x5b5   :  { %494 = vmatpush.bf16.msra.mxu3 %v1262_v27 }
 0x5b6   :  { %v338_v34 = vadd.f32 %v335_v33, %v1444_v3 }
 0x5b8   :  { %v342_v35 = vsel %vm83_vm0, %v338_v34, 0.0 }
 0x5b9   :  { %343 = vadd.xlane.f32.xlu1 %v342_v35 }
 0x624   :  { %v341_v2 = vpop.xlane.xlu1 %340 }
 0x625   :  { %v352_v43 = vmul.f32 %v1513_v42, %v341_v2 }
 0x627   :  { %v354_v44 = vsub.f32 %v337_v30, %v352_v43 }
 0x629   :  { %v356_v45 = vmul.f32 %v354_v44, %v354_v44 }
 0x62b   :  { %v358_v3 = vsel %vm83_vm0, %v356_v45, 0.0 }
 0x62c   :  { %359 = vadd.xlane.f32.xlu2 %v358_v3  ;;  %v344_v46 = vpop.xlane.xlu1 %343 }
 0x62d   :  { %v353_v47 = vmul.f32 %v1513_v42, %v344_v46 }
 0x62f   :  { %v355_v48 = vsub.f32 %v338_v34, %v353_v47 }
 0x631   :  { %v357_v49 = vmul.f32 %v355_v48, %v355_v48 }
 0x633   :  { %v361_v50 = vsel %vm83_vm0, %v357_v49, 0.0 }
 0x634   :  { %362 = vadd.xlane.f32.xlu1 %v361_v50  ;;  %v458_v50 = vperm.slane %v1452_v6, 5 }
 0x69f   :  { %v360_v52 = vpop.xlane.xlu2 %359 }
 0x6a0   :  { %v364_v54 = vmul.f32 %v360_v52, %v1513_v42 }
 0x6a2   :  { %v366_v55 = vadd.f32 1e-12, %v364_v54 }
 0x6a4   :  { %1339 = vrsqrt.f32 %v366_v55  ;;  %vm374_vm8 = vweird.f32 %v366_v55 }
 0x6a7   :  { %v363_v56 = vpop.xlane.xlu1 %362 }
 0x6a8   :  { %v365_v57 = vmul.f32 %v363_v56, %v1513_v42 }
 0x6aa   :  { %v1340_v58 = vpop.eup %1339  ;;  %v367_v59 = vadd.f32 1e-12, %v365_v57 }
 0x6ab   :  { %v369_v60 = vmul.f32 %v1340_v58, %v366_v55  ;;  %vm375_vm7 = vweird.f32 %v1340_v58 }
 0x6ac   :  { %1341 = vrsqrt.f32 %v367_v59  ;;  %vm376_vm9 = vmor %vm374_vm8, %vm375_vm7  ;;  %vm384_vm11 = vweird.f32 %v367_v59 }
 0x6ad   :  { %v370_v61 = vmul.f32 %v1340_v58, %v369_v60 }
 0x6af   :  { %v371_v62 = vmul.f32 0.5, %v370_v61 }
 0x6b1   :  { %v372_v63 = vsub.f32 1.5, %v371_v62 }
 0x6b2   :  { %v1342_v0 = vpop.eup %1341 }
 0x6b3   :  { %v373_v1 = vmul.f32 %v1340_v58, %v372_v63  ;;  %v379_v4 = vmul.f32 %v1342_v0, %v367_v59  ;;  %vm385_vm10 = vweird.f32 %v1342_v0 }
 0x6b4   :  { %vm386_vm12 = vmor %vm384_vm11, %vm385_vm10 }
 0x6b5   :  { %v380_v5 = vmul.f32 %v1342_v0, %v379_v4  ;;  %v377_v7 = vsel %vm376_vm9, %v1340_v58, %v373_v1 }
 0x6b6   :  { %v388_v10 = vmul.f32 %v377_v7, %v354_v44 }
 0x6b7   :  { %v381_v8 = vmul.f32 0.5, %v380_v5 }
 0x6b8   :  { %v391_v15 = vmul.f32 %v390_v11, %v388_v10 }
 0x6b9   :  { %v382_v9 = vsub.f32 1.5, %v381_v8  ;;  %v1267_v8 = vld [vmem:[%s1681_s1 + $0x18] sm:$0xff] }
 0x6ba   :  { %v394_v18 = vadd.f32 %v393_v16, %v391_v15  ;;  %581 = vmatpush.bf16.msra.mxu2 %v1267_v8 }
 0x6bb   :  { %v383_v12 = vmul.f32 %v1342_v0, %v382_v9 }
 0x6bd   :  { %v387_v13 = vsel %vm386_vm12, %v1342_v0, %v383_v12 }
 0x6be   :  { %v389_v14 = vmul.f32 %v387_v13, %v355_v48 }
 0x6c0   :  { %v392_v17 = vmul.f32 %v390_v11, %v389_v14  ;;  %v1266_v11 = vld [vmem:[%s1681_s1 + $0x10] sm:$0xff] }
 0x6c1   :  { %582 = vmatpush.bf16.msra.mxu2 %v1266_v11 }
 0x6c2   :  { %v395_v19 = vadd.f32 %v393_v16, %v392_v17 }
 0x6c4   :  { %v400_v20 = vpack.c.bf16 %v395_v19, %v394_v18 }
 0x6c6   :  { %1152 = vmatmul.msk.bf16.vlgmr.msrb.gmra.mxu1 %vm83_vm0, %v400_v20 }
 0x743   :  { %v426_v28 = vpop.f32.mrf.mxu1 }
 0x744   :  { %v427_v29 = vadd.f32 %v426_v28, %v401_v25 }
 0x746   :  { %v431_v30 = vmul.f32 %v427_v29, %v427_v29 }
 0x748   :  { %v433_v31 = vmul.f32 %v431_v30, %v427_v29  ;;  %v547_v30 = vperm.slane %v1452_v6, 6 }
 0x74a   :  { %v435_v32 = vmul.f32 0.044715, %v433_v31 }
 0x74b   :  { %v428_v33 = vpop.f32.mrf.mxu1 }
 0x74c   :  { %v437_v34 = vadd.f32 %v435_v32, %v427_v29  ;;  %v429_v35 = vadd.f32 %v428_v33, %v401_v25 }
 0x74e   :  { %v439_v36 = vmul.f32 0.7978846, %v437_v34  ;;  %v432_v37 = vmul.f32 %v429_v35, %v429_v35  ;;  %v550_v34 = vperm.slane %v1452_v6, 7 }
 0x750   :  { %v434_v38 = vmul.f32 %v432_v37, %v429_v35  ;;  %1343 = vtanh.f32 %v439_v36 }
 0x752   :  { %v436_v39 = vmul.f32 0.044715, %v434_v38 }
 0x754   :  { %v438_v40 = vadd.f32 %v436_v39, %v429_v35 }
 0x756   :  { %v440_v41 = vmul.f32 0.7978846, %v438_v40  ;;  %v1344_v2 = vpop.eup %1343 }
 0x757   :  { %v443_v43 = vadd.f32 1.0, %v1344_v2 }
 0x758   :  { %1345 = vtanh.f32 %v440_v41  ;;  %v1571_v41 = vld [vmem:[%s1683_s5 + $0x8] sm:$0xff] }
 0x759   :  { %v445_v45 = vmul.f32 0.5, %v443_v43  ;;  %v559_v2 = vperm.slane %v1571_v41, 0 }
 0x75b   :  { %v447_v47 = vmul.f32 %v445_v45, %v427_v29 }
 0x75e   :  { %v1346_v44 = vpop.eup %1345 }
 0x75f   :  { %v444_v3 = vadd.f32 1.0, %v1346_v44 }
 0x761   :  { %v446_v46 = vmul.f32 0.5, %v444_v3 }
 0x763   :  { %v448_v48 = vmul.f32 %v446_v46, %v429_v35 }
 0x765   :  { %v457_v49 = vpack.c.bf16 %v448_v48, %v447_v47 }
 0x767   :  { %1169 = vmatmul.msk.bf16.vlgmr.msra.gmra.mxu3 %vm483_vm13, %v457_v49 }
 0x7ea   :  { %v496_v51 = vpop.f32.mrf.mxu3 }
 0x7eb   :  { %v497_v52 = vadd.f32 %v496_v51, %v458_v50 }
 0x7ed   :  { %v501_v53 = vadd.f32 %v497_v52, %v394_v18 }
 0x7ef   :  { %v503_v54 = vsel %vm83_vm0, %v501_v53, 0.0 }
 0x7f0   :  { %504 = vadd.xlane.f32.xlu0 %v503_v54 }
 0x7f2   :  { %v498_v55 = vpop.f32.mrf.mxu3 }
 0x7f3   :  { %v499_v56 = vadd.f32 %v498_v55, %v458_v50 }
 0x7f5   :  { %v502_v57 = vadd.f32 %v499_v56, %v395_v19 }
 0x7f7   :  { %v506_v58 = vsel %vm83_vm0, %v502_v57, 0.0 }
 0x7f8   :  { %507 = vadd.xlane.f32.xlu1 %v506_v58 }
 0x863   :  { %v505_v59 = vpop.xlane.xlu0 %504 }
 0x864   :  { %v509_v60 = vmul.f32 %v505_v59, %v1513_v42 }
 0x866   :  { %v511_v61 = vsub.f32 %v501_v53, %v509_v60 }
 0x868   :  { %v513_v62 = vmul.f32 %v511_v61, %v511_v61 }
 0x86a   :  { %v515_v63 = vsel %vm83_vm0, %v513_v62, 0.0 }
 0x86b   :  { %v508_v0 = vpop.xlane.xlu1 %507  ;;  %516 = vadd.xlane.f32.xlu1 %v515_v63 }
 0x86c   :  { %v510_v1 = vmul.f32 %v508_v0, %v1513_v42 }
 0x86e   :  { %v512_v4 = vsub.f32 %v502_v57, %v510_v1 }
 0x870   :  { %v514_v5 = vmul.f32 %v512_v4, %v512_v4 }
 0x872   :  { %v518_v7 = vsel %vm83_vm0, %v514_v5, 0.0 }
 0x873   :  { %519 = vadd.xlane.f32.xlu1 %v518_v7 }
 0x8de   :  { %v517_v9 = vpop.xlane.xlu1 %516 }
 0x8df   :  { %v521_v10 = vmul.f32 %v517_v9, %v1513_v42 }
 0x8e1   :  { %v523_v12 = vadd.f32 1e-12, %v521_v10 }
 0x8e3   :  { %1347 = vrsqrt.f32 %v523_v12  ;;  %vm531_vm15 = vweird.f32 %v523_v12 }
 0x8e6   :  { %v520_v13 = vpop.xlane.xlu1 %519 }
 0x8e7   :  { %v522_v14 = vmul.f32 %v520_v13, %v1513_v42 }
 0x8e9   :  { %v1348_v15 = vpop.eup %1347  ;;  %v524_v16 = vadd.f32 1e-12, %v522_v14 }
 0x8ea   :  { %v526_v17 = vmul.f32 %v1348_v15, %v523_v12  ;;  %vm532_vm14 = vweird.f32 %v1348_v15 }
 0x8eb   :  { %1349 = vrsqrt.f32 %v524_v16  ;;  %vm533_vm2 = vmor %vm531_vm15, %vm532_vm14  ;;  %vm541_vm4 = vweird.f32 %v524_v16 }
 0x8ec   :  { %v527_v18 = vmul.f32 %v1348_v15, %v526_v17 }
 0x8ee   :  { %v528_v19 = vmul.f32 0.5, %v527_v18 }
 0x8f0   :  { %v529_v20 = vsub.f32 1.5, %v528_v19 }
 0x8f1   :  { %v1350_v21 = vpop.eup %1349 }
 0x8f2   :  { %v530_v23 = vmul.f32 %v1348_v15, %v529_v20  ;;  %v536_v24 = vmul.f32 %v1350_v21, %v524_v16  ;;  %vm542_vm3 = vweird.f32 %v1350_v21 }
 0x8f3   :  { %vm543_vm5 = vmor %vm541_vm4, %vm542_vm3  ;;  %vm1038_vm3 = vcmask 1040384   ;;  %vm1107_vm4 = vcmask 277504  }
 0x8f4   :  { %v537_v25 = vmul.f32 %v1350_v21, %v536_v24  ;;  %v534_v27 = vsel %vm533_vm2, %v1348_v15, %v530_v23 }
 0x8f5   :  { %v545_v31 = vmul.f32 %v534_v27, %v511_v61 }
 0x8f6   :  { %v538_v28 = vmul.f32 0.5, %v537_v25 }
 0x8f7   :  { %v548_v35 = vmul.f32 %v547_v30, %v545_v31 }
 0x8f8   :  { %v539_v29 = vsub.f32 1.5, %v538_v28 }
 0x8f9   :  { %v1561_v38 = vadd.f32 %v550_v34, %v548_v35 }
 0x8fa   :  { %v540_v32 = vmul.f32 %v1350_v21, %v539_v29 }
 0x8fc   :  { %v544_v33 = vsel %vm543_vm5, %v1350_v21, %v540_v32 }
 0x8fd   :  { %v546_v36 = vmul.f32 %v544_v33, %v512_v4 }
 0x8ff   :  { %v549_v37 = vmul.f32 %v547_v30, %v546_v36 }
 0x901   :  { %v1563_v39 = vadd.f32 %v550_v34, %v549_v37 }
 0x903   :  { %v558_v40 = vpack.c.bf16 %v1563_v39, %v1561_v38 }
 0x905   :  { %1182 = vmatmul.msk.bf16.vlgmr.msra.gmra.mxu2 %vm83_vm0, %v558_v40 }
 0x988   :  { %v584_v6 = vpop.f32.mrf.mxu2 }
 0x989   :  { %v585_v43 = vadd.f32 %v584_v6, %v559_v2 }
 0x98b   :  { %683 = vrot.lane.b32.xlu0 %v585_v43, %s1384_s13  ;;  %687 = vrot.lane.b32.xlu2 %v585_v43, %s1383_s12 }
 0x990   :  { %v586_v44 = vpop.f32.mrf.mxu2 }
 0x991   :  { %v587_v45 = vadd.f32 %v586_v44, %v559_v2 }
 0x993   :  { %689 = vrot.lane.b32.xlu1 %v587_v45, %s1383_s12  ;;  %591 = vrot.lane.b32.xlu0 %v585_v43, %s1381_s0  ;;  %v1306_v60 = vpack.i.bf16 %v585_v43, %v587_v45 }
 0x994   :  { %593 = vrot.lane.b32.xlu2 %v587_v45, %s1381_s0 }
 0x99b   :  { %685 = vrot.lane.b32.xlu1 %v587_v45, %s1384_s13 }
 0x9e5   :  { %v688_v3 = vpop.permute.xlu2 %687 }
 0x9ee   :  { %v594_v46 = vpop.permute.xlu2 %593 }
 0x9ef   :  { %1183 = vmatpush.xpose.msk.msra.mxu0 %vm107_vm1, %v594_v46  ;;  %1280 = vmatpush.xpose.msk.msra.mxu1 %vm107_vm1, %v594_v46  ;;  %v1268_v46 = vld [vmem:[%s1684_s2 + $0x10] sm:$0xff] }
 0x9fd   :  { %v684_v47 = vpop.permute.xlu0 %683 }
 0xa05   :  { %v690_v48 = vpop.permute.xlu1 %689  ;;  %v592_v49 = vpop.permute.xlu0 %591 }
 0xa06   :  { %1184 = vmatpush.xpose.msk.msra.mxu0 %vm107_vm1, %v592_v49  ;;  %1281 = vmatpush.xpose.msk.msra.mxu1 %vm107_vm1, %v592_v49 }
 0xa07   :  { %1189 = vmatpush.xpose.msk.msrb.mxu3 %vm107_vm1, %v690_v48 }
 0xa09   :  { %1185 = vmatmul.msk.f32.vlgmr.msra.gmra.mxu0 %vm107_vm1, %v585_v43  ;;  %1186 = vmatmul.msk.f32.vlgmr.msra.gmra.mxu1 %vm107_vm1, %v587_v45  ;;  %v1269_v43 = vld [vmem:[%s1684_s2 + $0x18] sm:$0xff] }
 0xa0a   :  { %817 = vmatpush.bf16.msrb.mxu0 %v1269_v43 }
 0xa0b   :  { %1190 = vmatpush.xpose.msk.msrb.mxu3 %vm107_vm1, %v688_v3 }
 0xa0d   :  { %v686_v50 = vpop.permute.xlu1 %685 }
 0xa0e   :  { %1191 = vmatmul.msk.f32.vlgmr.msrb.gmra.mxu3 %vm107_vm1, %v684_v47  ;;  %818 = vmatpush.bf16.msrb.mxu0 %v1268_v46  ;;  %v883_v46 = vperm.slane %v1571_v41, 1 }
 0xa16   :  { %1192 = vmatmul.msk.f32.gmra.mxu3 %vm107_vm1, %v686_v50 }
 0xa86   :  { %v620_v51 = vpop.f32.mrf.mxu0  ;;  %v623_v61 = vpop.f32.mrf.mxu1 }
 0xa87   :  { %v621_v52 = vadd.f32 %v620_v51, %v1470_v22  ;;  %v624_v62 = vadd.f32 %v623_v61, %v1474_v26 }
 0xa89   :  { %v626_v53 = vsel %vm107_vm1, %v621_v52, -inf  ;;  %v629_v63 = vsel %vm107_vm1, %v624_v62, -inf }
 0xa8a   :  { %627 = vmax.xlane.f32.xlu0 %v626_v53 }
 0xa91   :  { %v716_v54 = vpop.f32.mrf.mxu3 }
 0xa92   :  { %v717_v55 = vadd.f32 %v716_v54, %v1470_v22 }
 0xa94   :  { %v722_v56 = vsel %vm107_vm1, %v717_v55, -inf }
 0xa95   :  { %723 = vmax.xlane.f32.xlu1 %v722_v56 }
 0xa99   :  { %v719_v57 = vpop.f32.mrf.mxu3 }
 0xa9a   :  { %v720_v58 = vadd.f32 %v719_v57, %v1474_v26 }
 0xa9c   :  { %v725_v59 = vsel %vm107_vm1, %v720_v58, -inf }
 0xa9d   :  { %726 = vmax.xlane.f32.xlu2 %v725_v59 }
 0xa9e   :  { %1307 = vrot.lane.b32.xlu0 %v1306_v60, %s1386_s14 }
 0xaa5   :  { %630 = vmax.xlane.f32.xlu2 %v629_v63 }
 0xafd   :  { %v628_v0 = vpop.xlane.xlu0 %627 }
 0xafe   :  { %v632_v22 = vsub.f32 %v621_v52, %v628_v0 }
 0xb00   :  { %v634_v1 = vmul.f32 1.442695, %v632_v22 }
 0xb02   :  { %1351 = vpow2.f32 %v634_v1 }
 0xb08   :  { %v1352_v4 = vpop.eup %1351  ;;  %v724_v5 = vpop.xlane.xlu1 %723 }
 0xb09   :  { %v728_v7 = vsub.f32 %v717_v55, %v724_v5  ;;  %v638_v8 = vsel %vm107_vm1, %v1352_v4, 0.0  ;;  %v795_v55 = vperm.slane %v1571_v41, 2 }
 0xb0a   :  { %639 = vadd.xlane.f32.xlu2 %v638_v8 }
 0xb0b   :  { %v730_v9 = vmul.f32 1.442695, %v728_v7 }
 0xb0d   :  { %1353 = vpow2.f32 %v730_v9 }
 0xb10   :  { %v727_v10 = vpop.xlane.xlu2 %726  ;;  %v1308_v11 = vpop.permute.xlu0 %1307 }
 0xb11   :  { %v729_v12 = vsub.f32 %v720_v58, %v727_v10  ;;  %v1309_v13 = vunpack.i.l.bf16 %v1308_v11  ;;  %v1310_v15 = vunpack.i.h.bf16 %v1308_v11 }
 0xb13   :  { %v1354_v26 = vpop.eup %1353  ;;  %v732_v14 = vmul.f32 1.442695, %v729_v12  ;;  %770 = vmatpush.msrb.mxu2 %v1309_v13  ;;  %v1270_v13 = vld [vmem:[%s1685_s3 + $0x10] sm:$0xff] }
 0xb14   :  { %v734_v16 = vsel %vm107_vm1, %v1354_v26, 0.0 }
 0xb15   :  { %1355 = vpow2.f32 %v732_v14  ;;  %735 = vadd.xlane.f32.xlu1 %v734_v16  ;;  %771 = vmatpush.msrb.mxu2 %v1310_v15 }
 0xb18   :  { %v631_v17 = vpop.xlane.xlu2 %630 }
 0xb19   :  { %v633_v18 = vsub.f32 %v624_v62, %v631_v17 }
 0xb1b   :  { %v1356_v19 = vpop.eup %1355  ;;  %v636_v20 = vmul.f32 1.442695, %v633_v18 }
 0xb1c   :  { %v737_v21 = vsel %vm107_vm1, %v1356_v19, 0.0 }
 0xb1d   :  { %1357 = vpow2.f32 %v636_v20  ;;  %738 = vadd.xlane.f32.xlu1 %v737_v21 }
 0xb23   :  { %v1358_v23 = vpop.eup %1357 }
 0xb24   :  { %v641_v24 = vsel %vm107_vm1, %v1358_v23, 0.0 }
 0xb25   :  { %642 = vadd.xlane.f32.xlu2 %v641_v24 }
 0xb36   :  { %1312 = vrot.lane.b32.xlu1 %v1306_v60, %s1382_s11 }
 0xb7d   :  { %v640_v32 = vpop.xlane.xlu2 %639 }
 0xb88   :  { %v736_v25 = vpop.xlane.xlu1 %735 }
 0xb89   :  { %1359 = vrcp.f32 %v736_v25 }
 0xb8f   :  { %v1360_v27 = vpop.eup %1359 }
 0xb90   :  { %v742_v28 = vmul.f32 %v1360_v27, %v1354_v26  ;;  %v739_v29 = vpop.xlane.xlu1 %738 }
 0xb91   :  { %1361 = vrcp.f32 %v739_v29 }
 0xb92   :  { %1193 = vmatmul.msk.f32.vlgmr.msrb.gmra.mxu2 %vm107_vm1, %v742_v28  ;;  %1363 = vrcp.f32 %v640_v32 }
 0xb97   :  { %v1362_v30 = vpop.eup %1361 }
 0xb98   :  { %v743_v31 = vmul.f32 %v1362_v30, %v1356_v19  ;;  %v643_v33 = vpop.xlane.xlu2 %642  ;;  %v1364_v35 = vpop.eup %1363 }
 0xb99   :  { %1365 = vrcp.f32 %v643_v33  ;;  %v646_v40 = vmul.f32 %v1364_v35, %v1352_v4  ;;  %v874_v35 = vperm.slane %v1571_v41, 4 }
 0xb9a   :  { %1194 = vmatmul.msk.f32.gmra.mxu2 %vm107_vm1, %v743_v31  ;;  %v871_v31 = vperm.slane %v1571_v41, 3 }
 0xb9f   :  { %v1366_v2 = vpop.eup %1365 }
 0xba0   :  { %v647_v6 = vmul.f32 %v1366_v2, %v1358_v23 }
 0xba8   :  { %v1313_v34 = vpop.permute.xlu1 %1312 }
 0xba9   :  { %v1314_v36 = vunpack.i.l.bf16 %v1313_v34  ;;  %v1315_v37 = vunpack.i.h.bf16 %v1313_v34 }
 0xbab   :  { %674 = vmatpush.msrb.mxu1 %v1314_v36 }
 0xbad   :  { %675 = vmatpush.msrb.mxu1 %v1315_v37 }
 0xbae   :  { %1187 = vmatmul.msk.f32.vlgmr.msrb.gmra.mxu1 %vm107_vm1, %v646_v40 }
 0xbb6   :  { %1188 = vmatmul.msk.f32.gmra.mxu1 %vm107_vm1, %v647_v6 }
 0xc15   :  { %v773_v44 = vpop.f32.mrf.mxu2 }
 0xc1d   :  { %v776_v45 = vpop.f32.mrf.mxu2 }
 0xc1e   :  { %v1316_v3 = vpack.i.bf16 %v776_v45, %v773_v44  ;;  %v1275_v44 = vld [vmem:[%s1686_s4 + $0x38] sm:$0xff]  ;;  %v1274_v45 = vld [vmem:[%s1686_s4 + $0x30] sm:$0xff] }
 0xc1f   :  { %973 = vmatpush.bf16.msra.mxu3 %v1275_v44 }
 0xc20   :  { %1317 = vrot.lane.b32.xlu0 %v1316_v3, %s1387_s17  ;;  %v1273_v3 = vld [vmem:[%s1686_s4 + $0x28] sm:$0xff] }
 0xc23   :  { %974 = vmatpush.bf16.msra.mxu3 %v1274_v45 }
 0xc27   :  { %975 = vmatpush.bf16.msra.mxu3 %v1273_v3 }
 0xc2b   :  { %v677_v47 = vpop.f32.mrf.mxu1 }
 0xc33   :  { %v680_v51 = vpop.f32.mrf.mxu1 }
 0xc92   :  { %v1318_v48 = vpop.permute.xlu0 %1317 }
 0xc93   :  { %v1320_v49 = vunpack.i.h.bf16 %v1318_v48  ;;  %v1319_v50 = vunpack.i.l.bf16 %v1318_v48 }
 0xc95   :  { %v787_v52 = vsel %vm107_vm1, %v677_v47, %v1319_v50  ;;  %v788_v53 = vsel %vm107_vm1, %v680_v51, %v1320_v49  ;;  %v1272_v47 = vld [vmem:[%s1686_s4 + $0x20] sm:$0xff] }
 0xc96   :  { %v794_v54 = vpack.c.bf16 %v788_v53, %v787_v52  ;;  %976 = vmatpush.bf16.msra.mxu3 %v1272_v47 }
 0xc98   :  { %1207 = vmatmul.msk.bf16.vlgmr.msrb.gmra.mxu0 %vm83_vm0, %v794_v54 }
 0xd15   :  { %v820_v56 = vpop.f32.mrf.mxu0 }
 0xd16   :  { %v821_v57 = vadd.f32 %v820_v56, %v795_v55 }
 0xd18   :  { %v825_v58 = vadd.f32 %v821_v57, %v1561_v38 }
 0xd1a   :  { %v827_v59 = vsel %vm83_vm0, %v825_v58, 0.0 }
 0xd1b   :  { %828 = vadd.xlane.f32.xlu2 %v827_v59 }
 0xd1d   :  { %v822_v60 = vpop.f32.mrf.mxu0 }
 0xd1e   :  { %v823_v61 = vadd.f32 %v822_v60, %v795_v55 }
 0xd20   :  { %v826_v62 = vadd.f32 %v823_v61, %v1563_v39  ;;  %v1271_v39 = vld [vmem:[%s1685_s3 + $0x18] sm:$0xff] }
 0xd21   :  { %905 = vmatpush.bf16.msra.mxu1 %v1271_v39 }
 0xd22   :  { %v830_v63 = vsel %vm83_vm0, %v826_v62, 0.0 }
 0xd23   :  { %831 = vadd.xlane.f32.xlu0 %v830_v63 }
 0xd25   :  { %906 = vmatpush.bf16.msra.mxu1 %v1270_v13 }
 0xd8e   :  { %v829_v0 = vpop.xlane.xlu2 %828 }
 0xd8f   :  { %v833_v22 = vmul.f32 %v829_v0, %v1513_v42 }
 0xd91   :  { %v835_v1 = vsub.f32 %v825_v58, %v833_v22 }
 0xd93   :  { %v837_v4 = vmul.f32 %v835_v1, %v835_v1 }
 0xd95   :  { %v839_v5 = vsel %vm83_vm0, %v837_v4, 0.0 }
 0xd96   :  { %v832_v7 = vpop.xlane.xlu0 %831  ;;  %840 = vadd.xlane.f32.xlu2 %v839_v5 }
 0xd97   :  { %v834_v38 = vmul.f32 %v832_v7, %v1513_v42 }
 0xd99   :  { %v836_v8 = vsub.f32 %v826_v62, %v834_v38 }
 0xd9b   :  { %v838_v9 = vmul.f32 %v836_v8, %v836_v8 }
 0xd9d   :  { %v842_v10 = vsel %vm83_vm0, %v838_v9, 0.0  ;;  %v941_v9 = vperm.slane %v1571_v41, 5 }
 0xd9e   :  { %843 = vadd.xlane.f32.xlu1 %v842_v10 }
 0xe09   :  { %v841_v11 = vpop.xlane.xlu2 %840 }
 0xe0a   :  { %v845_v12 = vmul.f32 %v841_v11, %v1513_v42 }
 0xe0c   :  { %v847_v26 = vadd.f32 1e-12, %v845_v12 }
 0xe0e   :  { %1367 = vrsqrt.f32 %v847_v26  ;;  %vm855_vm6 = vweird.f32 %v847_v26 }
 0xe11   :  { %v844_v14 = vpop.xlane.xlu1 %843 }
 0xe12   :  { %v846_v15 = vmul.f32 %v844_v14, %v1513_v42 }
 0xe14   :  { %v1368_v16 = vpop.eup %1367  ;;  %v848_v17 = vadd.f32 1e-12, %v846_v15 }
 0xe15   :  { %v850_v18 = vmul.f32 %v1368_v16, %v847_v26  ;;  %vm856_vm1 = vweird.f32 %v1368_v16 }
 0xe16   :  { %1369 = vrsqrt.f32 %v848_v17  ;;  %vm857_vm7 = vmor %vm855_vm6, %vm856_vm1  ;;  %vm865_vm9 = vweird.f32 %v848_v17 }
 0xe17   :  { %v851_v19 = vmul.f32 %v1368_v16, %v850_v18 }
 0xe19   :  { %v852_v20 = vmul.f32 0.5, %v851_v19 }
 0xe1b   :  { %v853_v21 = vsub.f32 1.5, %v852_v20 }
 0xe1c   :  { %v1370_v23 = vpop.eup %1369 }
 0xe1d   :  { %v854_v24 = vmul.f32 %v1368_v16, %v853_v21  ;;  %v860_v25 = vmul.f32 %v1370_v23, %v848_v17  ;;  %vm866_vm8 = vweird.f32 %v1370_v23 }
 0xe1e   :  { %vm867_vm10 = vmor %vm865_vm9, %vm866_vm8 }
 0xe1f   :  { %v861_v27 = vmul.f32 %v1370_v23, %v860_v25  ;;  %v858_v28 = vsel %vm857_vm7, %v1368_v16, %v854_v24 }
 0xe20   :  { %v869_v32 = vmul.f32 %v858_v28, %v835_v1 }
 0xe21   :  { %v862_v29 = vmul.f32 0.5, %v861_v27  ;;  %v1277_v27 = vld [vmem:[%s1687_s6 + $0x8] sm:$0xff] }
 0xe22   :  { %v872_v36 = vmul.f32 %v871_v31, %v869_v32  ;;  %1067 = vmatpush.bf16.msra.mxu2 %v1277_v27 }
 0xe23   :  { %v863_v30 = vsub.f32 1.5, %v862_v29 }
 0xe24   :  { %v875_v2 = vadd.f32 %v874_v35, %v872_v36 }
 0xe25   :  { %v864_v33 = vmul.f32 %v1370_v23, %v863_v30 }
 0xe27   :  { %v868_v34 = vsel %vm867_vm10, %v1370_v23, %v864_v33  ;;  %v31_v33 = vld [vmem:[%s1683_s5 + $0x10] sm:$0xff]  ;;  %s1389_s5 = smov 32  }
 0xe28   :  { %v870_v37 = vmul.f32 %v868_v34, %v836_v8 }
 0xe2a   :  { %v873_v40 = vmul.f32 %v871_v31, %v870_v37  ;;  %v1276_v31 = vld [vmem:[%s1687_s6] sm:$0xff] }
 0xe2b   :  { %1068 = vmatpush.bf16.msra.mxu2 %v1276_v31  ;;  %1076 = vrot.lane.b32.xlu0 %v1276_v31, %s1381_s0 }
 0xe2c   :  { %v876_v6 = vadd.f32 %v874_v35, %v873_v40  ;;  %v1045_v35 = vperm.slane %v31_v33, 0 }
 0xe2e   :  { %v882_v43 = vpack.c.bf16 %v876_v6, %v875_v2  ;;  %1083 = vrot.lane.b32.xlu1 %v1045_v35, %s1381_s0 }
 0xe30   :  { %1220 = vmatmul.msk.bf16.vlgmr.msra.gmra.mxu1 %vm83_vm0, %v882_v43 }
 0xead   :  { %v908_v48 = vpop.f32.mrf.mxu1 }
 0xeae   :  { %v909_v49 = vadd.f32 %v908_v48, %v883_v46 }
 0xeb0   :  { %v913_v50 = vmul.f32 %v909_v49, %v909_v49 }
 0xeb2   :  { %v915_v51 = vmul.f32 %v913_v50, %v909_v49 }
 0xeb4   :  { %v917_v52 = vmul.f32 0.044715, %v915_v51  ;;  %v1032_v51 = vperm.slane %v1571_v41, 7 }
 0xeb5   :  { %v910_v53 = vpop.f32.mrf.mxu1 }
 0xeb6   :  { %v919_v54 = vadd.f32 %v917_v52, %v909_v49  ;;  %v911_v55 = vadd.f32 %v910_v53, %v883_v46 }
 0xeb8   :  { %v921_v56 = vmul.f32 0.7978846, %v919_v54  ;;  %v914_v57 = vmul.f32 %v911_v55, %v911_v55 }
 0xeba   :  { %v916_v58 = vmul.f32 %v914_v57, %v911_v55  ;;  %1371 = vtanh.f32 %v921_v56 }
 0xebc   :  { %v918_v59 = vmul.f32 0.044715, %v916_v58 }
 0xebe   :  { %v920_v60 = vadd.f32 %v918_v59, %v911_v55 }
 0xec0   :  { %v922_v61 = vmul.f32 0.7978846, %v920_v60  ;;  %v1372_v62 = vpop.eup %1371 }
 0xec1   :  { %v925_v63 = vadd.f32 1.0, %v1372_v62 }
 0xec2   :  { %1373 = vtanh.f32 %v922_v61 }
 0xec3   :  { %v927_v22 = vmul.f32 0.5, %v925_v63  ;;  %v1077_v63 = vpop.permute.xlu0 %1076 }
 0xec5   :  { %v929_v5 = vmul.f32 %v927_v22, %v909_v49 }
 0xec8   :  { %v1374_v0 = vpop.eup %1373 }
 0xec9   :  { %v926_v1 = vadd.f32 1.0, %v1374_v0 }
 0xecb   :  { %v928_v4 = vmul.f32 0.5, %v926_v1 }
 0xecd   :  { %v930_v7 = vmul.f32 %v928_v4, %v911_v55 }
 0xecf   :  { %v940_v38 = vpack.c.bf16 %v930_v7, %v929_v5  ;;  %v1084_v5 = vpop.permute.xlu1 %1083 }
 0xed1   :  { %1245 = vmatmul.msk.bf16.vlgmr.msra.gmra.mxu3 %vm483_vm13, %v940_v38 }
 0xf54   :  { %v978_v8 = vpop.f32.mrf.mxu3 }
 0xf55   :  { %v979_v12 = vadd.f32 %v978_v8, %v941_v9 }
 0xf57   :  { %v983_v26 = vadd.f32 %v979_v12, %v875_v2 }
 0xf59   :  { %v985_v14 = vsel %vm83_vm0, %v983_v26, 0.0 }
 0xf5c   :  { %v980_v10 = vpop.f32.mrf.mxu3 }
 0xf5d   :  { %v981_v39 = vadd.f32 %v980_v10, %v941_v9 }
 0xf5f   :  { %v984_v11 = vadd.f32 %v981_v39, %v876_v6 }
 0xf61   :  { %v988_v13 = vsel %vm83_vm0, %v984_v11, 0.0 }
 0xf62   :  { %989 = vadd.xlane.f32.xlu2 %v988_v13 }
 0xf6a   :  { %986 = vadd.xlane.f32.xlu2 %v985_v14 }
 0xfd5   :  { %v990_v15 = vpop.xlane.xlu2 %989 }
 0xfd6   :  { %v992_v16 = vmul.f32 %v990_v15, %v1513_v42 }
 0xfd8   :  { %v994_v17 = vsub.f32 %v984_v11, %v992_v16 }
 0xfda   :  { %v996_v18 = vmul.f32 %v994_v17, %v994_v17 }
 0xfdc   :  { %v1000_v19 = vsel %vm83_vm0, %v996_v18, 0.0 }
 0xfdd   :  { %1001 = vadd.xlane.f32.xlu2 %v1000_v19  ;;  %v987_v20 = vpop.xlane.xlu2 %986 }
 0xfde   :  { %v991_v21 = vmul.f32 %v987_v20, %v1513_v42 }
 0xfe0   :  { %v993_v23 = vsub.f32 %v983_v26, %v991_v21 }
 0xfe2   :  { %v995_v24 = vmul.f32 %v993_v23, %v993_v23 }
 0xfe4   :  { %v997_v25 = vsel %vm83_vm0, %v995_v24, 0.0 }
 0xfe5   :  { %998 = vadd.xlane.f32.xlu2 %v997_v25 }
 0xffd   :  { %1078 = vrot.lane.b32.xlu2 %v1277_v27, %s1381_s0 }
0x1050   :  { %v1002_v28 = vpop.xlane.xlu2 %1001 }
0x1051   :  { %v1004_v29 = vmul.f32 %v1002_v28, %v1513_v42 }
0x1053   :  { %v1006_v30 = vadd.f32 1e-12, %v1004_v29 }
0x1055   :  { %1375 = vrsqrt.f32 %v1006_v30  ;;  %vm1023_vm12 = vweird.f32 %v1006_v30 }
0x1058   :  { %v999_v32 = vpop.xlane.xlu2 %998 }
0x1059   :  { %v1003_v34 = vmul.f32 %v999_v32, %v1513_v42  ;;  %v1029_v42 = vperm.slane %v1571_v41, 6 }
0x105b   :  { %v1376_v36 = vpop.eup %1375  ;;  %v1005_v37 = vadd.f32 1e-12, %v1003_v34 }
0x105c   :  { %v1018_v40 = vmul.f32 %v1376_v36, %v1006_v30  ;;  %vm1024_vm11 = vweird.f32 %v1376_v36 }
0x105d   :  { %1377 = vrsqrt.f32 %v1005_v37  ;;  %vm1025_vm13 = vmor %vm1023_vm12, %vm1024_vm11  ;;  %vm1013_vm15 = vweird.f32 %v1005_v37 }
0x105e   :  { %v1019_v2 = vmul.f32 %v1376_v36, %v1018_v40 }
0x1060   :  { %v1020_v6 = vmul.f32 0.5, %v1019_v2  ;;  %v1079_v62 = vpop.permute.xlu2 %1078 }
0x1061   :  { %1095 = vmatpush.bf16.msra.mxu0 %v1079_v62 }
0x1062   :  { %v1021_v43 = vsub.f32 1.5, %v1020_v6 }
0x1063   :  { %v1378_v44 = vpop.eup %1377 }
0x1064   :  { %v1022_v45 = vmul.f32 %v1376_v36, %v1021_v43  ;;  %v1008_v3 = vmul.f32 %v1378_v44, %v1005_v37  ;;  %vm1014_vm14 = vweird.f32 %v1378_v44 }
0x1065   :  { %vm1015_vm2 = vmor %vm1013_vm15, %vm1014_vm14  ;;  %1096 = vmatpush.bf16.msra.mxu0 %v1077_v63 }
0x1066   :  { %v1026_v46 = vsel %vm1025_vm13, %v1376_v36, %v1022_v45  ;;  %v1009_v47 = vmul.f32 %v1378_v44, %v1008_v3 }
0x1067   :  { %v1028_v48 = vmul.f32 %v1026_v46, %v994_v17 }
0x1068   :  { %v1010_v49 = vmul.f32 0.5, %v1009_v47 }
0x1069   :  { %v1031_v52 = vmul.f32 %v1029_v42, %v1028_v48 }
0x106a   :  { %v1011_v50 = vsub.f32 1.5, %v1010_v49 }
0x106b   :  { %v1034_v55 = vadd.f32 %v1032_v51, %v1031_v52 }
0x106c   :  { %v1012_v53 = vmul.f32 %v1378_v44, %v1011_v50 }
0x106d   :  { %v1036_v58 = vrot.slane %v1034_v55, 7 }
0x106e   :  { %v1016_v54 = vsel %vm1015_vm2, %v1378_v44, %v1012_v53 }
0x106f   :  { %v1027_v56 = vmul.f32 %v1016_v54, %v993_v23 }
0x1071   :  { %v1030_v57 = vmul.f32 %v1029_v42, %v1027_v56 }
0x1073   :  { %v1033_v59 = vadd.f32 %v1032_v51, %v1030_v57 }
0x1075   :  { %v1039_v60 = vsel %vm1038_vm3, %v1033_v59, %v1036_v58 }
0x1076   :  { %v1044_v61 = vpack.c.bf16 %v1039_v60, %v1039_v60 }
0x1078   :  { %1254 = vmatmul.msk.bf16.vlgmr.msra.gmra.mxu2 %vm83_vm0, %v1044_v61 }
0x10fb   :  { %v1070_v41 = vpop.f32.mrf.mxu2 }
0x10fc   :  { %v1071_v0 = vadd.f32 %v1070_v41, %v1045_v35 }
0x10fe   :  { %1379 = vtanh.f32 %v1071_v0 }
0x1103   :  { %v1072_v22 = vpop.f32.mrf.mxu2 }
0x1104   :  { %v1380_v1 = vpop.eup %1379 }
0x1105   :  { %v1075_v4 = vpack.c.bf16 %v1380_v1, %v1380_v1 }
0x1107   :  { %1255 = vmatmul.msk.bf16.vlgmr.msra.gmra.mxu0 %vm83_vm0, %v1075_v4 }
0x1184   :  { %v1098_v7 = vpop.f32.mrf.mxu0 }
0x1185   :  { %v1099_v38 = vadd.f32 %v1098_v7, %v1084_v5 }
0x1187   :  { %1103 = vrot.lane.b32.xlu0 %v1099_v38, %s1389_s5 }
0x118c   :  { %v1100_v8 = vpop.f32.mrf.mxu0 }
0x11f9   :  { %v1104_v9 = vpop.permute.xlu0 %1103 }
0x11fa   :  { %v1106_v10 = vsel %vm83_vm0, %v1039_v60, %v1104_v9 }
0x11fb   :  { %v1108_v39 = vsel %vm1107_vm4, %v1106_v10, 0.0 }
0x11fc   :  { %1109 = vst [vmem:[%s1688_s7] sm:$0x3] %v1108_v39 }

</bundles_post_ra>
